<compile_context>
chip_gen: v7x
topology: tpu7x:2x2x1
jax: 0.10.0
libtpu: 0.0.40
codegen_flags: <defaults>
</compile_context>

<pallas_src>
import functools

import jax
import jax.numpy as jnp
from jax.experimental import pallas as pl
from jax.experimental.pallas import tpu as pltpu


D_MODEL = 32
TEXT_INIT_DIM = 64
VOCAB = 100
SEQ_LEN = 8
NUM_WAYPOINTS = 4
USE_FIRST_WAYPOINT = True


# ----------------------------------------------------------------------------
# Fused Pallas kernel: one grid step = one batch element b (covers all T maps)
# ----------------------------------------------------------------------------
def _fused_kernel(
    # data (per-b blocks)
    emb_ref, sem_ref, heat_ref,
    # weights (full blocks, resident across grid steps)
    bert_w_ref, bert_b_ref,
    te_w_ref, te_b_ref,
    me_w_ref, me_b_ref,
    wq_ref, bq_ref,
    wkv_ref, bkv_ref,
    wo_ref, bo_ref,
    cp_wm_ref, cp_wh_ref, cp_b_ref,
    ghc_w_ref, ghc_b_ref,
    # outputs
    heat_out_ref, attn_out_ref, cov_raw_ref, cov_ref,
    *, t_steps, r2, n_way, scale):
    f32 = jnp.float32

    # ---- text path (computed once per b, shared across T) ----------------
    emb = emb_ref[0]                                                  # (L, 64)
    text_feat = jnp.tanh(
        jnp.dot(emb, bert_w_ref[...], preferred_element_type=f32) + bert_b_ref[...])
    enc_text = (jnp.dot(text_feat, te_w_ref[...], preferred_element_type=f32)
                + te_b_ref[...])                                      # (L, D)
    kv = (jnp.dot(enc_text, wkv_ref[...], preferred_element_type=f32)
          + bkv_ref[...])                                             # (L, 2D)
    d = wq_ref.shape[0]
    k = kv[:, :d]
    v = kv[:, d:]

    # ---- map path: stride-2 subsampled map -> 1x1 conv (channel matmul) --
    sem = sem_ref[0]                                                  # (T*R2, C)
    enc_map = (jnp.dot(sem, me_w_ref[...], preferred_element_type=f32)
               + me_b_ref[...])                                       # (T*R2, D)
    q = jnp.dot(enc_map, wq_ref[...], preferred_element_type=f32) + bq_ref[...]

    # ---- cross-attention: every map position attends to the same keys ----
    s = jax.lax.dot_general(
        q, k, dimension_numbers=(((1,), (1,)), ((), ())),
        preferred_element_type=f32) * scale                           # (T*R2, L)
    m = jnp.max(s, axis=-1, keepdims=True)
    e = jnp.exp(s - m)
    p = e / jnp.sum(e, axis=-1, keepdims=True)
    attn_out_ref[0] = p.astype(attn_out_ref.dtype)
    o = jnp.dot(p, v, preferred_element_type=f32)                     # (T*R2, D)
    dec_out = jnp.dot(o, wo_ref[...], preferred_element_type=f32) + bo_ref[...]

    # ---- conv_point1 with the heat channel folded in (no K=33 concat) ----
    pred_in = (jnp.dot(dec_out, cp_wm_ref[...], preferred_element_type=f32)
               + heat_ref[0] * cp_wh_ref[...] + cp_b_ref[...])        # (T*R2, D)

    # ---- packed heads: [heatmap (n_way) | coverage (2*n_way)] ------------
    head = (jnp.dot(pred_in, ghc_w_ref[...], preferred_element_type=f32)
            + ghc_b_ref[...])                                         # (T*R2, 12)
    heat_out_ref[0] = head[:, :n_way].astype(heat_out_ref.dtype)

    # coverage head: mean-pool commutes with the linear head (bias is const)
    cov_cols = head[:, n_way:]                                        # (T*R2, 2*n_way)
    rows = [jnp.mean(cov_cols[t * r2:(t + 1) * r2, :], axis=0, keepdims=True)
            for t in range(t_steps)]
    cov_raw = jnp.concatenate(rows, axis=0)                           # (T, 2*n_way) packed [c0|c1]
    cov_raw_ref[0] = cov_raw.astype(cov_raw_ref.dtype)

    # 2-way softmax over the (class0, class1) pair on packed lanes
    c0 = cov_raw[:, :n_way]
    c1 = cov_raw[:, n_way:]
    mm = jnp.maximum(c0, c1)
    e0 = jnp.exp(c0 - mm)
    e1 = jnp.exp(c1 - mm)
    tot = e0 + e1
    cov_ref[0] = jnp.concatenate([e0 / tot, e1 / tot], axis=1).astype(cov_ref.dtype)


def fused_forward(w, emb, sem_flat, heat_flat, *, B, T, res, L):
    R2 = res * res
    nw = NUM_WAYPOINTS
    scale = 1.0 / float(D_MODEL) ** 0.5
    kernel = functools.partial(_fused_kernel, t_steps=T, r2=R2, n_way=nw, scale=scale)

    def data3(arr):
        return pl.BlockSpec((1,) + arr.shape[1:], lambda b: (b, 0, 0))

    def full2(arr):
        return pl.BlockSpec(arr.shape, lambda b: (0, 0))

    in_specs = [
        data3(emb), data3(sem_flat), data3(heat_flat),
        full2(w["bert_w"]), full2(w["bert_b"]),
        full2(w["te_w"]), full2(w["te_b"]),
        full2(w["me_w"]), full2(w["me_b"]),
        full2(w["wq"]), full2(w["bq"]),
        full2(w["wkv"]), full2(w["bkv"]),
        full2(w["wo"]), full2(w["bo"]),
        full2(w["cp_wm"]), full2(w["cp_wh"]), full2(w["cp_b"]),
        full2(w["ghc_w"]), full2(w["ghc_b"]),
    ]
    out_shapes = (
        jax.ShapeDtypeStruct((B, T * R2, nw), jnp.float32),       # heatmap head (packed)
        jax.ShapeDtypeStruct((B, T * R2, L), jnp.float32),        # dec_enc_attn
        jax.ShapeDtypeStruct((B, T, 2 * nw), jnp.float32),        # cov raw (packed [c0|c1])
        jax.ShapeDtypeStruct((B, T, 2 * nw), jnp.float32),        # cov softmax (packed)
    )
    out_specs = (
        pl.BlockSpec((1, T * R2, nw), lambda b: (b, 0, 0)),
        pl.BlockSpec((1, T * R2, L), lambda b: (b, 0, 0)),
        pl.BlockSpec((1, T, 2 * nw), lambda b: (b, 0, 0)),
        pl.BlockSpec((1, T, 2 * nw), lambda b: (b, 0, 0)),
    )
    return pl.pallas_call(
        kernel,
        out_shape=out_shapes,
        grid_spec=pltpu.PrefetchScalarGridSpec(
            num_scalar_prefetch=0,
            grid=(B,),
            in_specs=in_specs,
            out_specs=out_specs,
        ),
        compiler_params=pltpu.CompilerParams(
            dimension_semantics=("parallel",)),
    )(emb, sem_flat, heat_flat,
      w["bert_w"], w["bert_b"], w["te_w"], w["te_b"], w["me_w"], w["me_b"],
      w["wq"], w["bq"], w["wkv"], w["bkv"], w["wo"], w["bo"],
      w["cp_wm"], w["cp_wh"], w["cp_b"], w["ghc_w"], w["ghc_b"])


# ----------------------------------------------------------------------------
# Glue (plain JAX): embeddings, nearest-neighbor resize, weight packing
# ----------------------------------------------------------------------------
def nearest_resize(x, out_h, out_w):
    """PyTorch F.interpolate(mode='nearest') on the last two dims (integer ratio)."""
    H, W = x.shape[-2], x.shape[-1]
    ri = (jnp.arange(out_h) * H) // out_h
    ci = (jnp.arange(out_w) * W) // out_w
    return x[..., ri, :][..., :, ci]


def init_params(key):
    ks = jax.random.split(key, 16)

    def w(k, shape, scale=0.05):
        return jax.random.normal(k, shape, jnp.float32) * scale

    return {
        # synthetic "bert"
        "tok_emb": w(ks[0], (VOCAB, TEXT_INIT_DIM)),
        "seg_emb": w(ks[1], (2, TEXT_INIT_DIM)),
        "bert_w": w(ks[2], (TEXT_INIT_DIM, TEXT_INIT_DIM)),
        "bert_b": jnp.zeros((TEXT_INIT_DIM,), jnp.float32),
        # text_encoder (nn.Linear(text_init_dim, d_model))
        "te_w": w(ks[3], (TEXT_INIT_DIM, D_MODEL)),
        "te_b": jnp.zeros((D_MODEL,), jnp.float32),
        # synthetic map_encoder (stride-2 1x1 conv, C -> d_model)
        "me_w": w(ks[4], (4, D_MODEL)),
        "me_b": jnp.zeros((D_MODEL,), jnp.float32),
        # synthetic attention_model (single-head cross attention)
        "wq": w(ks[5], (D_MODEL, D_MODEL)),
        "wq_b": jnp.zeros((D_MODEL,), jnp.float32),
        "wk": w(ks[6], (D_MODEL, D_MODEL)),
        "wk_b": jnp.zeros((D_MODEL,), jnp.float32),
        "wv": w(ks[7], (D_MODEL, D_MODEL)),
        "wv_b": jnp.zeros((D_MODEL,), jnp.float32),
        "wo": w(ks[8], (D_MODEL, D_MODEL)),
        "wo_b": jnp.zeros((D_MODEL,), jnp.float32),
        # conv_point1: nn.Conv2d(d_model + 1, d_model, 1)
        "cp_w": w(ks[9], (D_MODEL + 1, D_MODEL)),
        "cp_b": jnp.zeros((D_MODEL,), jnp.float32),
        # synthetic goal_pred_model: heatmap head (1x1 conv) + coverage head
        "gh_w": w(ks[10], (D_MODEL, NUM_WAYPOINTS)),
        "gh_b": jnp.zeros((NUM_WAYPOINTS,), jnp.float32),
        "gc_w": w(ks[11], (D_MODEL, NUM_WAYPOINTS * 2)),
        "gc_b": jnp.zeros((NUM_WAYPOINTS * 2,), jnp.float32),
    }


def prepare_fused_params(p):
    """Pack weights for the fused kernel (done once, outside the kernel)."""
    nw = NUM_WAYPOINTS
    # coverage head columns repacked [w0c0,w0c1,...] -> [c0(w0..w3) | c1(w0..w3)]
    gc_w_packed = p["gc_w"].reshape(D_MODEL, nw, 2).transpose(0, 2, 1).reshape(D_MODEL, 2 * nw)
    gc_b_packed = p["gc_b"].reshape(nw, 2).T.reshape(-1)
    return {
        "bert_w": p["bert_w"], "bert_b": p["bert_b"].reshape(1, -1),
        "te_w": p["te_w"], "te_b": p["te_b"].reshape(1, -1),
        "me_w": p["me_w"], "me_b": p["me_b"].reshape(1, -1),
        "wq": p["wq"], "bq": p["wq_b"].reshape(1, -1),
        "wkv": jnp.concatenate([p["wk"], p["wv"]], axis=1),
        "bkv": jnp.concatenate([p["wk_b"], p["wv_b"]]).reshape(1, -1),
        "wo": p["wo"], "bo": p["wo_b"].reshape(1, -1),
        "cp_wm": p["cp_w"][:D_MODEL, :],
        "cp_wh": p["cp_w"][D_MODEL:, :],
        "cp_b": p["cp_b"].reshape(1, -1),
        "ghc_w": jnp.concatenate([p["gh_w"], gc_w_packed], axis=1),
        "ghc_b": jnp.concatenate([p["gh_b"], gc_b_packed]).reshape(1, -1),
    }


# ----------------------------------------------------------------------------
# Forward
# ----------------------------------------------------------------------------
def vln_goal_predictor_forward(params, batch):
    semantic_map = batch["map_semantic"]                      # (B, T, C, H, W)
    tokens = batch["tokens_tensor"].astype(jnp.int32)[:, 0, :]     # squeeze(1)
    segments = batch["segments_tensors"].astype(jnp.int32)[:, 0, :]
    B, T, C, H, W = semantic_map.shape
    L = tokens.shape[1]

    # bert_model front end: token + segment embedding lookup (gather; glue)
    emb = params["tok_emb"][tokens] + params["seg_emb"][segments]   # (B, L, 64)

    # map_encoder front end: channel-last stride-2 subsample (map_enc_res = H//2)
    sem_nhwc = jnp.transpose(semantic_map, (0, 1, 3, 4, 2))         # (B,T,H,W,C)
    sem_sub = sem_nhwc[:, :, ::2, ::2, :]                           # (B,T,res,res,C)
    res = sem_sub.shape[2]
    R2 = res * res
    sem_flat = sem_sub.reshape(B, T * R2, C)

    if USE_FIRST_WAYPOINT:
        point = batch["goal_heatmap"][:, :, 0, :, :]                # (B,T,cH,cW)
        point = nearest_resize(point, res, res)                     # (B,T,res,res)
        heat_flat = point.reshape(B, T * R2, 1)
    else:
        # TODO(synk): use_first_waypoint=False would skip conv_point1; the fused
        # kernel is specialized for the True path used in this script.
        heat_flat = jnp.zeros((B, T * R2, 1), jnp.float32)

    prep = prepare_fused_params(params)
    heat_out, attn_out, cov_raw_out, cov_out = fused_forward(
        prep, emb.astype(jnp.float32), sem_flat, heat_flat, B=B, T=T, res=res, L=L)

    # lane-dense kernel outputs -> reference layouts (tiny relayouts, done once)
    waypoints_heatmaps = jnp.transpose(
        heat_out.reshape(B * T, res, res, NUM_WAYPOINTS), (0, 3, 1, 2))  # (BT,nW,res,res)
    dec_enc_attns = [attn_out.reshape(B * T, R2, L)]
    waypoints_cov_raw = jnp.transpose(
        cov_raw_out.reshape(B * T, 2, NUM_WAYPOINTS), (0, 2, 1))         # (BT,nW,2)
    waypoints_cov = jnp.transpose(
        cov_out.reshape(B * T, 2, NUM_WAYPOINTS), (0, 2, 1))             # (BT,nW,2)

    return waypoints_heatmaps, waypoints_cov_raw, waypoints_cov, dec_enc_attns


# ----------------------------------------------------------------------------
# Driver
# ----------------------------------------------------------------------------
if __name__ == "__main__":
    key = jax.random.PRNGKey(0)
    k_param, k_map, k_tok, k_seg, k_goal = jax.random.split(key, 5)

    B, T, C, H, W = 2, 2, 4, 16, 16
    params = init_params(k_param)

    batch = {
        "map_semantic": jax.random.normal(k_map, (B, T, C, H, W), jnp.float32),
        "tokens_tensor": jax.random.randint(k_tok, (B, 1, SEQ_LEN), 0, VOCAB),
        "segments_tensors": jax.random.randint(k_seg, (B, 1, SEQ_LEN), 0, 2),
        "goal_heatmap": jax.random.uniform(k_goal, (B, T, NUM_WAYPOINTS, H, W), jnp.float32),
    }

    heatmaps, cov_raw, cov, attns = vln_goal_predictor_forward(params, batch)
    jax.block_until_ready((heatmaps, cov_raw, cov, attns[0]))

    assert heatmaps.shape == (B * T, NUM_WAYPOINTS, H // 2, W // 2)
    assert cov_raw.shape == (B * T, NUM_WAYPOINTS, 2)
    assert cov.shape == (B * T, NUM_WAYPOINTS, 2)
    assert attns[0].shape == (B * T, (H // 2) * (W // 2), SEQ_LEN)
    # softmax rows sum to 1
    assert bool(jnp.allclose(jnp.sum(cov, axis=-1), 1.0, atol=1e-5))
    # attention rows sum to 1
    assert bool(jnp.allclose(jnp.sum(attns[0], axis=-1), 1.0, atol=1e-5))

    print("KERNEL_OK")
</pallas_src>

<mosaic_0001>
module attributes {stable_mosaic.version = 11 : i64} {
  func.func @_fused_kernel(%arg0: i32, %arg1: memref<1x8x64xf32, #tpu.memory_space<vmem>>, %arg2: memref<1x128x4xf32, #tpu.memory_space<vmem>>, %arg3: memref<1x128x1xf32, #tpu.memory_space<vmem>>, %arg4: memref<64x64xf32, #tpu.memory_space<vmem>>, %arg5: memref<1x64xf32, #tpu.memory_space<vmem>>, %arg6: memref<64x32xf32, #tpu.memory_space<vmem>>, %arg7: memref<1x32xf32, #tpu.memory_space<vmem>>, %arg8: memref<4x32xf32, #tpu.memory_space<vmem>>, %arg9: memref<1x32xf32, #tpu.memory_space<vmem>>, %arg10: memref<32x32xf32, #tpu.memory_space<vmem>>, %arg11: memref<1x32xf32, #tpu.memory_space<vmem>>, %arg12: memref<32x64xf32, #tpu.memory_space<vmem>>, %arg13: memref<1x64xf32, #tpu.memory_space<vmem>>, %arg14: memref<32x32xf32, #tpu.memory_space<vmem>>, %arg15: memref<1x32xf32, #tpu.memory_space<vmem>>, %arg16: memref<32x32xf32, #tpu.memory_space<vmem>>, %arg17: memref<1x32xf32, #tpu.memory_space<vmem>>, %arg18: memref<1x32xf32, #tpu.memory_space<vmem>>, %arg19: memref<32x12xf32, #tpu.memory_space<vmem>>, %arg20: memref<1x12xf32, #tpu.memory_space<vmem>>, %arg21: memref<1x128x4xf32, #tpu.memory_space<vmem>>, %arg22: memref<1x128x8xf32, #tpu.memory_space<vmem>>, %arg23: memref<1x2x8xf32, #tpu.memory_space<vmem>>, %arg24: memref<1x2x8xf32, #tpu.memory_space<vmem>>) attributes {dimension_semantics = [#tpu.dimension_semantics<parallel>], iteration_bounds = array<i64: 2>, scalar_prefetch = 0 : i64, scratch_operands = 0 : i64, tpu.core_type = #tpu.core_type<tc>, window_params = [{transform_indices = @transform_0, window_bounds = array<i64: 1, 8, 64>}, {transform_indices = @transform_1, window_bounds = array<i64: 1, 128, 4>}, {transform_indices = @transform_2, window_bounds = array<i64: 1, 128, 1>}, {pipeline_mode = #tpu.pipeline_mode<synchronous>, transform_indices = @transform_3, window_bounds = array<i64: 64, 64>}, {pipeline_mode = #tpu.pipeline_mode<synchronous>, transform_indices = @transform_4, window_bounds = array<i64: 1, 64>}, {pipeline_mode = #tpu.pipeline_mode<synchronous>, transform_indices = @transform_5, window_bounds = array<i64: 64, 32>}, {pipeline_mode = #tpu.pipeline_mode<synchronous>, transform_indices = @transform_6, window_bounds = array<i64: 1, 32>}, {pipeline_mode = #tpu.pipeline_mode<synchronous>, transform_indices = @transform_7, window_bounds = array<i64: 4, 32>}, {pipeline_mode = #tpu.pipeline_mode<synchronous>, transform_indices = @transform_8, window_bounds = array<i64: 1, 32>}, {pipeline_mode = #tpu.pipeline_mode<synchronous>, transform_indices = @transform_9, window_bounds = array<i64: 32, 32>}, {pipeline_mode = #tpu.pipeline_mode<synchronous>, transform_indices = @transform_10, window_bounds = array<i64: 1, 32>}, {pipeline_mode = #tpu.pipeline_mode<synchronous>, transform_indices = @transform_11, window_bounds = array<i64: 32, 64>}, {pipeline_mode = #tpu.pipeline_mode<synchronous>, transform_indices = @transform_12, window_bounds = array<i64: 1, 64>}, {pipeline_mode = #tpu.pipeline_mode<synchronous>, transform_indices = @transform_13, window_bounds = array<i64: 32, 32>}, {pipeline_mode = #tpu.pipeline_mode<synchronous>, transform_indices = @transform_14, window_bounds = array<i64: 1, 32>}, {pipeline_mode = #tpu.pipeline_mode<synchronous>, transform_indices = @transform_15, window_bounds = array<i64: 32, 32>}, {pipeline_mode = #tpu.pipeline_mode<synchronous>, transform_indices = @transform_16, window_bounds = array<i64: 1, 32>}, {pipeline_mode = #tpu.pipeline_mode<synchronous>, transform_indices = @transform_17, window_bounds = array<i64: 1, 32>}, {pipeline_mode = #tpu.pipeline_mode<synchronous>, transform_indices = @transform_18, window_bounds = array<i64: 32, 12>}, {pipeline_mode = #tpu.pipeline_mode<synchronous>, transform_indices = @transform_19, window_bounds = array<i64: 1, 12>}, {transform_indices = @transform_20, window_bounds = array<i64: 1, 128, 4>}, {transform_indices = @transform_21, window_bounds = array<i64: 1, 128, 8>}, {transform_indices = @transform_22, window_bounds = array<i64: 1, 2, 8>}, {transform_indices = @transform_23, window_bounds = array<i64: 1, 2, 8>}]} {
    %c0 = arith.constant 0 : index
    %c0_0 = arith.constant 0 : index
    %c0_1 = arith.constant 0 : index
    %0 = vector.load %arg1[%c0, %c0_0, %c0_1] : memref<1x8x64xf32, #tpu.memory_space<vmem>>, vector<1x8x64xf32>
    %1 = vector.shape_cast %0 : vector<1x8x64xf32> to vector<8x64xf32>
    %c0_2 = arith.constant 0 : index
    %c0_3 = arith.constant 0 : index
    %2 = vector.load %arg4[%c0_2, %c0_3] : memref<64x64xf32, #tpu.memory_space<vmem>>, vector<64x64xf32>
    %cst = arith.constant dense<0.000000e+00> : vector<8x64xf32>
    %3 = tpu.matmul %1, %2, %cst {dimension_numbers = #tpu.dot_dimension_numbers<[1], [0], [0], [1], [0, 0, 1, 1], [], []>} : vector<8x64xf32>, vector<64x64xf32>, vector<8x64xf32> -> vector<8x64xf32>
    %c0_4 = arith.constant 0 : index
    %c0_5 = arith.constant 0 : index
    %4 = vector.load %arg5[%c0_4, %c0_5] : memref<1x64xf32, #tpu.memory_space<vmem>>, vector<1x64xf32>
    %5 = vector.broadcast %4 : vector<1x64xf32> to vector<8x64xf32>
    %6 = arith.addf %3, %5 : vector<8x64xf32>
    %7 = math.tanh %6 : vector<8x64xf32>
    %c0_6 = arith.constant 0 : index
    %c0_7 = arith.constant 0 : index
    %8 = vector.load %arg6[%c0_6, %c0_7] : memref<64x32xf32, #tpu.memory_space<vmem>>, vector<64x32xf32>
    %cst_8 = arith.constant dense<0.000000e+00> : vector<8x32xf32>
    %9 = tpu.matmul %7, %8, %cst_8 {dimension_numbers = #tpu.dot_dimension_numbers<[1], [0], [0], [1], [0, 0, 1, 1], [], []>} : vector<8x64xf32>, vector<64x32xf32>, vector<8x32xf32> -> vector<8x32xf32>
    %c0_9 = arith.constant 0 : index
    %c0_10 = arith.constant 0 : index
    %10 = vector.load %arg7[%c0_9, %c0_10] : memref<1x32xf32, #tpu.memory_space<vmem>>, vector<1x32xf32>
    %11 = vector.broadcast %10 : vector<1x32xf32> to vector<8x32xf32>
    %12 = arith.addf %9, %11 : vector<8x32xf32>
    %c0_11 = arith.constant 0 : index
    %c0_12 = arith.constant 0 : index
    %13 = vector.load %arg12[%c0_11, %c0_12] : memref<32x64xf32, #tpu.memory_space<vmem>>, vector<32x64xf32>
    %cst_13 = arith.constant dense<0.000000e+00> : vector<8x64xf32>
    %14 = tpu.matmul %12, %13, %cst_13 {dimension_numbers = #tpu.dot_dimension_numbers<[1], [0], [0], [1], [0, 0, 1, 1], [], []>} : vector<8x32xf32>, vector<32x64xf32>, vector<8x64xf32> -> vector<8x64xf32>
    %c0_14 = arith.constant 0 : index
    %c0_15 = arith.constant 0 : index
    %15 = vector.load %arg13[%c0_14, %c0_15] : memref<1x64xf32, #tpu.memory_space<vmem>>, vector<1x64xf32>
    %16 = vector.broadcast %15 : vector<1x64xf32> to vector<8x64xf32>
    %17 = arith.addf %14, %16 : vector<8x64xf32>
    %18 = vector.extract_strided_slice %17 {offsets = [0, 0], sizes = [8, 32], strides = [1, 1]} : vector<8x64xf32> to vector<8x32xf32>
    %19 = vector.extract_strided_slice %17 {offsets = [0, 32], sizes = [8, 32], strides = [1, 1]} : vector<8x64xf32> to vector<8x32xf32>
    %c0_16 = arith.constant 0 : index
    %c0_17 = arith.constant 0 : index
    %c0_18 = arith.constant 0 : index
    %20 = vector.load %arg2[%c0_16, %c0_17, %c0_18] : memref<1x128x4xf32, #tpu.memory_space<vmem>>, vector<1x128x4xf32>
    %21 = vector.shape_cast %20 : vector<1x128x4xf32> to vector<128x4xf32>
    %c0_19 = arith.constant 0 : index
    %c0_20 = arith.constant 0 : index
    %22 = vector.load %arg8[%c0_19, %c0_20] : memref<4x32xf32, #tpu.memory_space<vmem>>, vector<4x32xf32>
    %cst_21 = arith.constant dense<0.000000e+00> : vector<128x32xf32>
    %23 = tpu.matmul %21, %22, %cst_21 {dimension_numbers = #tpu.dot_dimension_numbers<[1], [0], [0], [1], [0, 0, 1, 1], [], []>} : vector<128x4xf32>, vector<4x32xf32>, vector<128x32xf32> -> vector<128x32xf32>
    %c0_22 = arith.constant 0 : index
    %c0_23 = arith.constant 0 : index
    %24 = vector.load %arg9[%c0_22, %c0_23] : memref<1x32xf32, #tpu.memory_space<vmem>>, vector<1x32xf32>
    %25 = vector.broadcast %24 : vector<1x32xf32> to vector<128x32xf32>
    %26 = arith.addf %23, %25 : vector<128x32xf32>
    %c0_24 = arith.constant 0 : index
    %c0_25 = arith.constant 0 : index
    %27 = vector.load %arg10[%c0_24, %c0_25] : memref<32x32xf32, #tpu.memory_space<vmem>>, vector<32x32xf32>
    %cst_26 = arith.constant dense<0.000000e+00> : vector<128x32xf32>
    %28 = tpu.matmul %26, %27, %cst_26 {dimension_numbers = #tpu.dot_dimension_numbers<[1], [0], [0], [1], [0, 0, 1, 1], [], []>} : vector<128x32xf32>, vector<32x32xf32>, vector<128x32xf32> -> vector<128x32xf32>
    %c0_27 = arith.constant 0 : index
    %c0_28 = arith.constant 0 : index
    %29 = vector.load %arg11[%c0_27, %c0_28] : memref<1x32xf32, #tpu.memory_space<vmem>>, vector<1x32xf32>
    %30 = vector.broadcast %29 : vector<1x32xf32> to vector<128x32xf32>
    %31 = arith.addf %28, %30 : vector<128x32xf32>
    %cst_29 = arith.constant dense<0.000000e+00> : vector<128x8xf32>
    %32 = tpu.matmul %31, %18, %cst_29 {dimension_numbers = #tpu.dot_dimension_numbers<[1], [1], [0], [0], [0, 0, 1, 0], [], []>} : vector<128x32xf32>, vector<8x32xf32>, vector<128x8xf32> -> vector<128x8xf32>
    %cst_30 = arith.constant 0.176776692 : f32
    %33 = vector.broadcast %cst_30 : f32 to vector<128x8xf32>
    %34 = arith.mulf %32, %33 : vector<128x8xf32>
    %cst_31 = arith.constant dense<0xFF800000> : vector<128xf32>
    %35 = vector.multi_reduction <maximumf>, %34, %cst_31 [1] : vector<128x8xf32> to vector<128xf32>
    %36 = vector.shape_cast %35 : vector<128xf32> to vector<128x1xf32>
    %37 = vector.broadcast %36 : vector<128x1xf32> to vector<128x8xf32>
    %38 = arith.subf %34, %37 : vector<128x8xf32>
    %39 = math.exp %38 : vector<128x8xf32>
    %cst_32 = arith.constant dense<0.000000e+00> : vector<128xf32>
    %40 = vector.multi_reduction <add>, %39, %cst_32 [1] : vector<128x8xf32> to vector<128xf32>
    %41 = vector.shape_cast %40 : vector<128xf32> to vector<128x1xf32>
    %42 = vector.broadcast %41 : vector<128x1xf32> to vector<128x8xf32>
    %43 = arith.divf %39, %42 : vector<128x8xf32>
    %c0_33 = arith.constant 0 : index
    %c0_34 = arith.constant 0 : index
    %c0_35 = arith.constant 0 : index
    %44 = vector.load %arg22[%c0_33, %c0_34, %c0_35] : memref<1x128x8xf32, #tpu.memory_space<vmem>>, vector<1x128x8xf32>
    %45 = vector.shape_cast %44 : vector<1x128x8xf32> to vector<128x8xf32>
    %46 = vector.shape_cast %43 : vector<128x8xf32> to vector<1x128x8xf32>
    tpu.vector_store %arg22[%c0_33, %c0_34, %c0_35], %46 {strides = array<i32>} : memref<1x128x8xf32, #tpu.memory_space<vmem>>, vector<1x128x8xf32>,
    %cst_36 = arith.constant dense<0.000000e+00> : vector<128x32xf32>
    %47 = tpu.matmul %43, %19, %cst_36 {dimension_numbers = #tpu.dot_dimension_numbers<[1], [0], [0], [1], [0, 0, 1, 1], [], []>} : vector<128x8xf32>, vector<8x32xf32>, vector<128x32xf32> -> vector<128x32xf32>
    %c0_37 = arith.constant 0 : index
    %c0_38 = arith.constant 0 : index
    %48 = vector.load %arg14[%c0_37, %c0_38] : memref<32x32xf32, #tpu.memory_space<vmem>>, vector<32x32xf32>
    %cst_39 = arith.constant dense<0.000000e+00> : vector<128x32xf32>
    %49 = tpu.matmul %47, %48, %cst_39 {dimension_numbers = #tpu.dot_dimension_numbers<[1], [0], [0], [1], [0, 0, 1, 1], [], []>} : vector<128x32xf32>, vector<32x32xf32>, vector<128x32xf32> -> vector<128x32xf32>
    %c0_40 = arith.constant 0 : index
    %c0_41 = arith.constant 0 : index
    %50 = vector.load %arg15[%c0_40, %c0_41] : memref<1x32xf32, #tpu.memory_space<vmem>>, vector<1x32xf32>
    %51 = vector.broadcast %50 : vector<1x32xf32> to vector<128x32xf32>
    %52 = arith.addf %49, %51 : vector<128x32xf32>
    %c0_42 = arith.constant 0 : index
    %c0_43 = arith.constant 0 : index
    %53 = vector.load %arg16[%c0_42, %c0_43] : memref<32x32xf32, #tpu.memory_space<vmem>>, vector<32x32xf32>
    %cst_44 = arith.constant dense<0.000000e+00> : vector<128x32xf32>
    %54 = tpu.matmul %52, %53, %cst_44 {dimension_numbers = #tpu.dot_dimension_numbers<[1], [0], [0], [1], [0, 0, 1, 1], [], []>} : vector<128x32xf32>, vector<32x32xf32>, vector<128x32xf32> -> vector<128x32xf32>
    %c0_45 = arith.constant 0 : index
    %c0_46 = arith.constant 0 : index
    %c0_47 = arith.constant 0 : index
    %55 = vector.load %arg3[%c0_45, %c0_46, %c0_47] : memref<1x128x1xf32, #tpu.memory_space<vmem>>, vector<1x128x1xf32>
    %56 = vector.shape_cast %55 : vector<1x128x1xf32> to vector<128x1xf32>
    %c0_48 = arith.constant 0 : index
    %c0_49 = arith.constant 0 : index
    %57 = vector.load %arg17[%c0_48, %c0_49] : memref<1x32xf32, #tpu.memory_space<vmem>>, vector<1x32xf32>
    %58 = vector.broadcast %56 : vector<128x1xf32> to vector<128x32xf32>
    %59 = vector.broadcast %57 : vector<1x32xf32> to vector<128x32xf32>
    %60 = arith.mulf %58, %59 : vector<128x32xf32>
    %61 = arith.addf %54, %60 : vector<128x32xf32>
    %c0_50 = arith.constant 0 : index
    %c0_51 = arith.constant 0 : index
    %62 = vector.load %arg18[%c0_50, %c0_51] : memref<1x32xf32, #tpu.memory_space<vmem>>, vector<1x32xf32>
    %63 = vector.broadcast %62 : vector<1x32xf32> to vector<128x32xf32>
    %64 = arith.addf %61, %63 : vector<128x32xf32>
    %c0_52 = arith.constant 0 : index
    %c0_53 = arith.constant 0 : index
    %65 = vector.load %arg19[%c0_52, %c0_53] : memref<32x12xf32, #tpu.memory_space<vmem>>, vector<32x12xf32>
    %cst_54 = arith.constant dense<0.000000e+00> : vector<128x12xf32>
    %66 = tpu.matmul %64, %65, %cst_54 {dimension_numbers = #tpu.dot_dimension_numbers<[1], [0], [0], [1], [0, 0, 1, 1], [], []>} : vector<128x32xf32>, vector<32x12xf32>, vector<128x12xf32> -> vector<128x12xf32>
    %c0_55 = arith.constant 0 : index
    %c0_56 = arith.constant 0 : index
    %67 = vector.load %arg20[%c0_55, %c0_56] : memref<1x12xf32, #tpu.memory_space<vmem>>, vector<1x12xf32>
    %68 = vector.broadcast %67 : vector<1x12xf32> to vector<128x12xf32>
    %69 = arith.addf %66, %68 : vector<128x12xf32>
    %70 = vector.extract_strided_slice %69 {offsets = [0, 0], sizes = [128, 4], strides = [1, 1]} : vector<128x12xf32> to vector<128x4xf32>
    %c0_57 = arith.constant 0 : index
    %c0_58 = arith.constant 0 : index
    %c0_59 = arith.constant 0 : index
    %71 = vector.load %arg21[%c0_57, %c0_58, %c0_59] : memref<1x128x4xf32, #tpu.memory_space<vmem>>, vector<1x128x4xf32>
    %72 = vector.shape_cast %71 : vector<1x128x4xf32> to vector<128x4xf32>
    %73 = vector.shape_cast %70 : vector<128x4xf32> to vector<1x128x4xf32>
    tpu.vector_store %arg21[%c0_57, %c0_58, %c0_59], %73 {strides = array<i32>} : memref<1x128x4xf32, #tpu.memory_space<vmem>>, vector<1x128x4xf32>,
    %74 = vector.extract_strided_slice %69 {offsets = [0, 4], sizes = [128, 8], strides = [1, 1]} : vector<128x12xf32> to vector<128x8xf32>
    %75 = vector.extract_strided_slice %74 {offsets = [0, 0], sizes = [64, 8], strides = [1, 1]} : vector<128x8xf32> to vector<64x8xf32>
    %cst_60 = arith.constant dense<0.000000e+00> : vector<8xf32>
    %76 = vector.multi_reduction <add>, %75, %cst_60 [0] : vector<64x8xf32> to vector<8xf32>
    %77 = vector.shape_cast %76 : vector<8xf32> to vector<1x8xf32>
    %cst_61 = arith.constant 6.400000e+01 : f32
    %78 = vector.broadcast %cst_61 : f32 to vector<1x8xf32>
    %79 = arith.divf %77, %78 : vector<1x8xf32>
    %80 = vector.extract_strided_slice %74 {offsets = [64, 0], sizes = [64, 8], strides = [1, 1]} : vector<128x8xf32> to vector<64x8xf32>
    %cst_62 = arith.constant dense<0.000000e+00> : vector<8xf32>
    %81 = vector.multi_reduction <add>, %80, %cst_62 [0] : vector<64x8xf32> to vector<8xf32>
    %82 = vector.shape_cast %81 : vector<8xf32> to vector<1x8xf32>
    %cst_63 = arith.constant 6.400000e+01 : f32
    %83 = vector.broadcast %cst_63 : f32 to vector<1x8xf32>
    %84 = arith.divf %82, %83 : vector<1x8xf32>
    %85 = tpu.concatenate %79, %84 in 0 : vector<1x8xf32>, vector<1x8xf32> -> vector<2x8xf32>
    %c0_64 = arith.constant 0 : index
    %c0_65 = arith.constant 0 : index
    %c0_66 = arith.constant 0 : index
    %86 = vector.load %arg23[%c0_64, %c0_65, %c0_66] : memref<1x2x8xf32, #tpu.memory_space<vmem>>, vector<1x2x8xf32>
    %87 = vector.shape_cast %86 : vector<1x2x8xf32> to vector<2x8xf32>
    %88 = vector.shape_cast %85 : vector<2x8xf32> to vector<1x2x8xf32>
    tpu.vector_store %arg23[%c0_64, %c0_65, %c0_66], %88 {strides = array<i32>} : memref<1x2x8xf32, #tpu.memory_space<vmem>>, vector<1x2x8xf32>,
    %89 = vector.extract_strided_slice %85 {offsets = [0, 0], sizes = [2, 4], strides = [1, 1]} : vector<2x8xf32> to vector<2x4xf32>
    %90 = vector.extract_strided_slice %85 {offsets = [0, 4], sizes = [2, 4], strides = [1, 1]} : vector<2x8xf32> to vector<2x4xf32>
    %91 = arith.maximumf %89, %90 : vector<2x4xf32>
    %92 = arith.subf %89, %91 : vector<2x4xf32>
    %93 = math.exp %92 : vector<2x4xf32>
    %94 = arith.subf %90, %91 : vector<2x4xf32>
    %95 = math.exp %94 : vector<2x4xf32>
    %96 = arith.addf %93, %95 : vector<2x4xf32>
    %97 = arith.divf %93, %96 : vector<2x4xf32>
    %98 = arith.divf %95, %96 : vector<2x4xf32>
    %99 = tpu.concatenate %97, %98 in 1 : vector<2x4xf32>, vector<2x4xf32> -> vector<2x8xf32>
    %c0_67 = arith.constant 0 : index
    %c0_68 = arith.constant 0 : index
    %c0_69 = arith.constant 0 : index
    %100 = vector.load %arg24[%c0_67, %c0_68, %c0_69] : memref<1x2x8xf32, #tpu.memory_space<vmem>>, vector<1x2x8xf32>
    %101 = vector.shape_cast %100 : vector<1x2x8xf32> to vector<2x8xf32>
    %102 = vector.shape_cast %99 : vector<2x8xf32> to vector<1x2x8xf32>
    tpu.vector_store %arg24[%c0_67, %c0_68, %c0_69], %102 {strides = array<i32>} : memref<1x2x8xf32, #tpu.memory_space<vmem>>, vector<1x2x8xf32>,
    return
  }
  func.func @transform_0(%arg0: i32) -> (i32, i32, i32) {
    %c0_i32 = arith.constant 0 : i32
    %c0_i32_0 = arith.constant 0 : i32
    %c0_i32_1 = arith.constant 0 : i32
    return %arg0, %c0_i32, %c0_i32_0 : i32, i32, i32
  }
  func.func @transform_1(%arg0: i32) -> (i32, i32, i32) {
    %c0_i32 = arith.constant 0 : i32
    %c0_i32_0 = arith.constant 0 : i32
    %c0_i32_1 = arith.constant 0 : i32
    return %arg0, %c0_i32, %c0_i32_0 : i32, i32, i32
  }
  func.func @transform_2(%arg0: i32) -> (i32, i32, i32) {
    %c0_i32 = arith.constant 0 : i32
    %c0_i32_0 = arith.constant 0 : i32
    %c0_i32_1 = arith.constant 0 : i32
    return %arg0, %c0_i32, %c0_i32_0 : i32, i32, i32
  }
  func.func @transform_3(%arg0: i32) -> (i32, i32) {
    %c0_i32 = arith.constant 0 : i32
    %c0_i32_0 = arith.constant 0 : i32
    %c0_i32_1 = arith.constant 0 : i32
    return %c0_i32, %c0_i32_0 : i32, i32
  }
  func.func @transform_4(%arg0: i32) -> (i32, i32) {
    %c0_i32 = arith.constant 0 : i32
    %c0_i32_0 = arith.constant 0 : i32
    %c0_i32_1 = arith.constant 0 : i32
    return %c0_i32, %c0_i32_0 : i32, i32
  }
  func.func @transform_5(%arg0: i32) -> (i32, i32) {
    %c0_i32 = arith.constant 0 : i32
    %c0_i32_0 = arith.constant 0 : i32
    %c0_i32_1 = arith.constant 0 : i32
    return %c0_i32, %c0_i32_0 : i32, i32
  }
  func.func @transform_6(%arg0: i32) -> (i32, i32) {
    %c0_i32 = arith.constant 0 : i32
    %c0_i32_0 = arith.constant 0 : i32
    %c0_i32_1 = arith.constant 0 : i32
    return %c0_i32, %c0_i32_0 : i32, i32
  }
  func.func @transform_7(%arg0: i32) -> (i32, i32) {
    %c0_i32 = arith.constant 0 : i32
    %c0_i32_0 = arith.constant 0 : i32
    %c0_i32_1 = arith.constant 0 : i32
    return %c0_i32, %c0_i32_0 : i32, i32
  }
  func.func @transform_8(%arg0: i32) -> (i32, i32) {
    %c0_i32 = arith.constant 0 : i32
    %c0_i32_0 = arith.constant 0 : i32
    %c0_i32_1 = arith.constant 0 : i32
    return %c0_i32, %c0_i32_0 : i32, i32
  }
  func.func @transform_9(%arg0: i32) -> (i32, i32) {
    %c0_i32 = arith.constant 0 : i32
    %c0_i32_0 = arith.constant 0 : i32
    %c0_i32_1 = arith.constant 0 : i32
    return %c0_i32, %c0_i32_0 : i32, i32
  }
  func.func @transform_10(%arg0: i32) -> (i32, i32) {
    %c0_i32 = arith.constant 0 : i32
    %c0_i32_0 = arith.constant 0 : i32
    %c0_i32_1 = arith.constant 0 : i32
    return %c0_i32, %c0_i32_0 : i32, i32
  }
  func.func @transform_11(%arg0: i32) -> (i32, i32) {
    %c0_i32 = arith.constant 0 : i32
    %c0_i32_0 = arith.constant 0 : i32
    %c0_i32_1 = arith.constant 0 : i32
    return %c0_i32, %c0_i32_0 : i32, i32
  }
  func.func @transform_12(%arg0: i32) -> (i32, i32) {
    %c0_i32 = arith.constant 0 : i32
    %c0_i32_0 = arith.constant 0 : i32
    %c0_i32_1 = arith.constant 0 : i32
    return %c0_i32, %c0_i32_0 : i32, i32
  }
  func.func @transform_13(%arg0: i32) -> (i32, i32) {
    %c0_i32 = arith.constant 0 : i32
    %c0_i32_0 = arith.constant 0 : i32
    %c0_i32_1 = arith.constant 0 : i32
    return %c0_i32, %c0_i32_0 : i32, i32
  }
  func.func @transform_14(%arg0: i32) -> (i32, i32) {
    %c0_i32 = arith.constant 0 : i32
    %c0_i32_0 = arith.constant 0 : i32
    %c0_i32_1 = arith.constant 0 : i32
    return %c0_i32, %c0_i32_0 : i32, i32
  }
  func.func @transform_15(%arg0: i32) -> (i32, i32) {
    %c0_i32 = arith.constant 0 : i32
    %c0_i32_0 = arith.constant 0 : i32
    %c0_i32_1 = arith.constant 0 : i32
    return %c0_i32, %c0_i32_0 : i32, i32
  }
  func.func @transform_16(%arg0: i32) -> (i32, i32) {
    %c0_i32 = arith.constant 0 : i32
    %c0_i32_0 = arith.constant 0 : i32
    %c0_i32_1 = arith.constant 0 : i32
    return %c0_i32, %c0_i32_0 : i32, i32
  }
  func.func @transform_17(%arg0: i32) -> (i32, i32) {
    %c0_i32 = arith.constant 0 : i32
    %c0_i32_0 = arith.constant 0 : i32
    %c0_i32_1 = arith.constant 0 : i32
    return %c0_i32, %c0_i32_0 : i32, i32
  }
  func.func @transform_18(%arg0: i32) -> (i32, i32) {
    %c0_i32 = arith.constant 0 : i32
    %c0_i32_0 = arith.constant 0 : i32
    %c0_i32_1 = arith.constant 0 : i32
    return %c0_i32, %c0_i32_0 : i32, i32
  }
  func.func @transform_19(%arg0: i32) -> (i32, i32) {
    %c0_i32 = arith.constant 0 : i32
    %c0_i32_0 = arith.constant 0 : i32
    %c0_i32_1 = arith.constant 0 : i32
    return %c0_i32, %c0_i32_0 : i32, i32
  }
  func.func @transform_20(%arg0: i32) -> (i32, i32, i32) {
    %c0_i32 = arith.constant 0 : i32
    %c0_i32_0 = arith.constant 0 : i32
    %c0_i32_1 = arith.constant 0 : i32
    return %arg0, %c0_i32, %c0_i32_0 : i32, i32, i32
  }
  func.func @transform_21(%arg0: i32) -> (i32, i32, i32) {
    %c0_i32 = arith.constant 0 : i32
    %c0_i32_0 = arith.constant 0 : i32
    %c0_i32_1 = arith.constant 0 : i32
    return %arg0, %c0_i32, %c0_i32_0 : i32, i32, i32
  }
  func.func @transform_22(%arg0: i32) -> (i32, i32, i32) {
    %c0_i32 = arith.constant 0 : i32
    %c0_i32_0 = arith.constant 0 : i32
    %c0_i32_1 = arith.constant 0 : i32
    return %arg0, %c0_i32, %c0_i32_0 : i32, i32, i32
  }
  func.func @transform_23(%arg0: i32) -> (i32, i32, i32) {
    %c0_i32 = arith.constant 0 : i32
    %c0_i32_0 = arith.constant 0 : i32
    %c0_i32_1 = arith.constant 0 : i32
    return %arg0, %c0_i32, %c0_i32_0 : i32, i32, i32
  }
}

</mosaic_0001>

<bundles_post_ra>
// kernel: tpu_custom_call.1
= control target key start
LH: loop header
LB: loop body
LE: loop exit
PB: predicated region body
PF: predicated region fallthrough
CT: control target
= control target key end

     0   :  { %s4877_s0 = inlined_call_operand.vmem [shape: f32[2,8,64], index: 0, kind: input, shape index: {}]   ;;  %s4878_s1 = inlined_call_operand.vmem [shape: f32[2,128,4], index: 1, kind: input, shape index: {}]   ;;  %s4879_s2 = inlined_call_operand.vmem [shape: f32[2,128,1], index: 2, kind: input, shape index: {}]   ;;  %s4880_s3 = inlined_call_operand.vmem [shape: f32[64,64], index: 3, kind: input, shape index: {}]   ;;  %s4881_s4 = inlined_call_operand.vmem [shape: f32[1,64], index: 4, kind: input, shape index: {}]   ;;  %s4882_s5 = inlined_call_operand.vmem [shape: f32[64,32], index: 5, kind: input, shape index: {}]   ;;  %s4883_s6 = inlined_call_operand.vmem [shape: f32[1,32], index: 6, kind: input, shape index: {}]   ;;  %s4884_s7 = inlined_call_operand.vmem [shape: f32[4,32], index: 7, kind: input, shape index: {}]   ;;  %s4885_s8 = inlined_call_operand.vmem [shape: f32[1,32], index: 8, kind: input, shape index: {}]   ;;  %s4886_s9 = inlined_call_operand.vmem [shape: f32[32,32], index: 9, kind: input, shape index: {}]   ;;  %s4887_s10 = inlined_call_operand.vmem [shape: f32[1,32], index: 10, kind: input, shape index: {}]   ;;  %s4888_s11 = inlined_call_operand.vmem [shape: f32[32,64], index: 11, kind: input, shape index: {}]   ;;  %s4889_s12 = inlined_call_operand.vmem [shape: f32[1,64], index: 12, kind: input, shape index: {}]   ;;  %s4890_s13 = inlined_call_operand.vmem [shape: f32[32,32], index: 13, kind: input, shape index: {}]   ;;  %s4891_s14 = inlined_call_operand.vmem [shape: f32[1,32], index: 14, kind: input, shape index: {}]   ;;  %s4892_s15 = inlined_call_operand.vmem [shape: f32[32,32], index: 15, kind: input, shape index: {}]   ;;  %s4893_s16 = inlined_call_operand.vmem [shape: f32[1,32], index: 16, kind: input, shape index: {}]   ;;  %s4894_s17 = inlined_call_operand.vmem [shape: f32[1,32], index: 17, kind: input, shape index: {}]   ;;  %s4895_s18 = inlined_call_operand.vmem [shape: f32[32,12], index: 18, kind: input, shape index: {}]   ;;  %s4896_s19 = inlined_call_operand.vmem [shape: f32[1,12], index: 19, kind: input, shape index: {}]   ;;  %s4897_s20 = inlined_call_operand.vmem [shape: f32[2,128,4], index: 20, kind: output, shape index: {0}]   ;;  %s4898_s21 = inlined_call_operand.vmem [shape: f32[2,128,8], index: 21, kind: output, shape index: {1}]   ;;  %s4899_s22 = inlined_call_operand.hbm [shape: f32[2,2,8], index: 22, kind: output, shape index: {2}]   ;;  %s4900_s23 = inlined_call_operand.hbm [shape: f32[2,2,8], index: 23, kind: output, shape index: {3}]  }
   0x1   :  { %4914 = sst [smem:[#allocation14_spill]] %s4877_s0 }
   0x2   :  { %4915 = sst [smem:[#allocation15_spill]] %s4878_s1 }
   0x3   :  { %4916 = sst [smem:[#allocation16_spill]] %s4879_s2 }
   0x4   :  { %4917 = sst [smem:[#allocation17_spill]] %s4880_s3 }
   0x5   :  { %4918 = sst [smem:[#allocation18_spill]] %s4881_s4 }
   0x6   :  { %4919 = sst [smem:[#allocation19_spill]] %s4882_s5 }
   0x7   :  { %4920 = sst [smem:[#allocation20_spill]] %s4883_s6 }
   0x8   :  { %4921 = sst [smem:[#allocation21_spill]] %s4884_s7 }
   0x9   :  { %29 = vsyncpa [#allocation3], 0 }
   0xa   :  { %31 = vsyncpa [#allocation3 + $0x1], 0 }
   0xb   :  { %32 = vsyncpa [#allocation5], 0 }
   0xc   :  { %34 = vsyncpa [#allocation5 + $0x1], 0  ;;  %s4112_s4 = smov 0   ;;  %s4114_s30 = smov 0  }
   0xd   :  { %s4116_s24 = smov 0   ;;  %s4118_s25 = smov 0  }
   0xe LB: > { %4922 = sst [smem:[#allocation8_spill]] %s3969_s4  ;;  %s4133_s5 = sadd.s32 4294967295, %s3981_s25   ;;  %s3981_s25 = sphi %s4118_s25, %s4944_s25   ;;  %s3977_s24 = sphi %s4116_s24, %s4946_s24   ;;  %s3973_s30 = sphi %s4114_s30, %s4948_s30   ;;  %s3969_s4 = sphi %s4112_s4, %s4947_s4  }
   0xf   : > { %4923 = sst [smem:[#allocation9_spill]] %s3977_s24  ;;  %s3136_s1 = sadd.s32 4294967294, %s3981_s25  }
  0x10   : > { %4924 = sst [smem:[#allocation10_spill]] %s3981_s25  ;;  %s4137_s26 = sadd.s32 1, %s3981_s25  }
  0x11   : > { %4925 = sst [smem:[#allocation11_spill]] %s4137_s26  ;;  %s534_s2 = sadd.s32 1, %s3977_s24 }
  0x12   : > { %s531_s6 = ssub.s32 %s3981_s25, %s4137_s26  ;;  %p544_p0 = scmp.ne.s32.totalorder %s3977_s24, %s3973_s30 }
  0x13   : > { %p532_p1 = scmp.eq.s32.totalorder %s531_s6, 0  ;;  %p545_p2 = scmp.eq.s32.totalorder %s4133_s5, 1 }
  0x14   : > { %p550_p3 = scmp.ne.s32.totalorder %s3973_s30, %s3969_s4  ;;  %p551_p4 = scmp.eq.s32.totalorder %s3136_s1, 1 }
  0x15   : > { %s4148_s27 = scalar_select %p532_p1, %s3977_s24, %s534_s2  }
  0x16   : > { %p4150_p5 = por %p545_p2, %p544_p0  ;;  %p4154_p6 = por %p551_p4, %p550_p3 }
  0x17   : > { %4926 = sst [smem:[#allocation12_spill]] %s4148_s27  ;;  %p3139_p7 = scmp.ge.s32.totalorder %s3981_s25, 1 }
  0x18   : > { %s4928_s28 = scalar_select %p4154_p6, 1, 0 }
  0x19   : > { %p669_p8 = scmp.lt.s32.totalorder %s3981_s25, 3 }
  0x1a   : > { %4929 = sst [smem:[#allocation13_spill]] %s4928_s28 }
  0x1b   : > { %p670_p9 = pnand %p3139_p7, %p669_p8 }
  0x1c   : > { %s4930_s0 = sld [smem:[#allocation17_spill]] (!%p670_p9)  ;;  %v3983_v3 = vmov (!%p670_p9), 0.0|0.0   ;;  %vm3984_vm0 = vmmov (!%p670_p9), 0   ;;  %v3985_v6 = vmov (!%p670_p9), 0.0   ;;  %p757_p10 = scmp.lt.s32.totalorder (!%p670_p9), %s4133_s5, 1  ;;  %vm797_vm1 = vcmask (!%p670_p9), 523264  }
  0x1d   : > { %673 = sbr.rel (%p670_p9) target bundleno = 3010 (0xbc2), region = 100  ;;  %3696 = vmatprep.subr.bf16.mxu0 (!%p670_p9), %v3983_v3  ;;  %3457 = vmatprep.mubr.msk.f32.mxu0 (!%p670_p9), %vm3984_vm0, %v3985_v6  ;;  %s4931_s1 = sld [smem:[#allocation19_spill]] (!%p670_p9)  ;;  %v960_v27 = vld [vmem:[%s4888_s11] sm:$0xff] (!%p670_p9)  ;;  %v961_v28 = vld [vmem:[%s4888_s11 + $0x8] sm:$0xff] (!%p670_p9)  ;;  %v962_v35 = vld [vmem:[%s4888_s11 + $0x10] sm:$0xff] (!%p670_p9)  ;;  %vm1118_vm2 = vcmask (!%p670_p9), 1043456  }
  0x1e   : > { %3708 = vmatprep.subr.bf16.mxu1 (!%p670_p9), %v3983_v3  ;;  %3476 = vmatprep.mubr.msk.f32.mxu1 (!%p670_p9), %vm3984_vm0, %v3985_v6  ;;  %s4932_s4 = sld [smem:[#allocation14_spill]] (!%p670_p9)  ;;  %v3721_v29 = vpack.c.bf16 (!%p670_p9), %v961_v28, %v960_v27  ;;  %v963_v36 = vld [vmem:[%s4888_s11 + $0x18] sm:$0xff] (!%p670_p9)  ;;  %s4935_s6 = sld [smem:[#allocation15_spill]] (!%p670_p9)  ;;  %vm1069_vm3 = vcmask (!%p670_p9), 31744   ;;  %vm971_vm4 = vcmask (!%p670_p9), 261120   ;;  %v1267_v59 = vld [vmem:[%s4886_s9] sm:$0xff] (!%p670_p9) }
  0x1f   : > { %v3724_v37 = vpack.c.bf16 (!%p670_p9), %v963_v36, %v962_v35  ;;  %s4936_s2 = sld [smem:[#allocation20_spill]] (!%p670_p9)  ;;  %v1268_v60 = vld [vmem:[%s4886_s9 + $0x8] sm:$0xff] (!%p670_p9)  ;;  %v1269_v62 = vld [vmem:[%s4886_s9 + $0x10] sm:$0xff] (!%p670_p9)  ;;  %v1270_v63 = vld [vmem:[%s4886_s9 + $0x18] sm:$0xff] (!%p670_p9)  ;;  %vm1683_vm5 = vcmask (!%p670_p9), 64512   ;;  %vm2835_vm6 = vcmask (!%p670_p9), 97312  }
  0x20   : > { %v3726_v61 = vpack.c.bf16 (!%p670_p9), %v1268_v60, %v1267_v59  ;;  %vm2881_vm7 = vcmask (!%p670_p9), 1040384   ;;  %vm2887_vm8 = vcmask (!%p670_p9), 58368   ;;  %s3989_s24 = smov (!%p670_p9), 4   ;;  %s4913_s28 = sshll.u32 (!%p670_p9), %s4133_s5, 5 }
  0x22   : > { %v782_v0 = vld [vmem:[%s4930_s0] sm:$0xff] (!%p670_p9)  ;;  %v783_v1 = vld [vmem:[%s4930_s0 + $0x8] sm:$0xff] (!%p670_p9)  ;;  %v784_v2 = vld [vmem:[%s4930_s0 + $0x10] sm:$0xff] (!%p670_p9) }
  0x23   : > { %v3697_v4 = vpack.c.bf16 (!%p670_p9), %v783_v1, %v782_v0  ;;  %v785_v5 = vld [vmem:[%s4930_s0 + $0x18] sm:$0xff] (!%p670_p9)  ;;  %v872_v7 = vld [vmem:[%s4931_s1] sm:$0xff] (!%p670_p9)  ;;  %v873_v9 = vld [vmem:[%s4931_s1 + $0x8] sm:$0xff] (!%p670_p9)  ;;  %v3730_v0 = vpack.c.bf16 (!%p670_p9), %v1270_v63, %v1269_v62 }
  0x24   : > { %v3700_v8 = vpack.c.bf16 %v785_v5, %v784_v2  ;;  %v786_v10 = vld [vmem:[%s4930_s0 + $0x20] sm:$0xff]  ;;  %v787_v11 = vld [vmem:[%s4930_s0 + $0x28] sm:$0xff]  ;;  %v3709_v12 = vpack.c.bf16 %v873_v9, %v872_v7  ;;  %s4188_s29 = scalar_select %p757_p10, %s4133_s5, 1  ;;  %v788_v14 = vld [vmem:[%s4930_s0 + $0x30] sm:$0xff] }
  0x25   : > { %3698 = vmatpush3.bf16.msra.mxu0 %v3697_v4  ;;  %v3703_v13 = vpack.c.bf16 %v787_v11, %v786_v10  ;;  %v789_v15 = vld [vmem:[%s4930_s0 + $0x38] sm:$0xff]  ;;  %v874_v18 = vld [vmem:[%s4931_s1 + $0x10] sm:$0xff]  ;;  %v876_v21 = vld [vmem:[%s4931_s1 + $0x20] sm:$0xff] }
  0x26   : > { %3699 = vmatprep.subr.bf16.mxu0 %v3983_v3  ;;  %3710 = vmatpush3.bf16.msra.mxu1 %v3709_v12  ;;  %s3142_s26 = sshll.u32 %s4188_s29, 3  ;;  %v3706_v16 = vpack.c.bf16 %v789_v15, %v788_v14  ;;  %v875_v19 = vld [vmem:[%s4931_s1 + $0x18] sm:$0xff]  ;;  %v877_v22 = vld [vmem:[%s4931_s1 + $0x28] sm:$0xff]  ;;  %v878_v24 = vld [vmem:[%s4931_s1 + $0x30] sm:$0xff]  ;;  %s4243_s0 = sshll.u32 %s4188_s29, 7 }
  0x27   : > { %3711 = vmatprep.subr.bf16.mxu1 %v3983_v3  ;;  %s760_s25 = scalar_lea.vmem %s4932_s4, %s3142_s26  ;;  %v3712_v20 = vpack.c.bf16 %v875_v19, %v874_v18  ;;  %v3715_v23 = vpack.c.bf16 %v877_v22, %v876_v21  ;;  %v879_v25 = vld [vmem:[%s4931_s1 + $0x38] sm:$0xff]  ;;  %s4933_s26 = sld [smem:[#allocation18_spill]]  ;;  %v3153_v49 = vld [vmem:[%s4936_s2] ss:$0 sm:$0xff] }
  0x28   : > { %v781_v17 = vld [vmem:[%s760_s25] sm:$0xff]  ;;  %v3718_v26 = vpack.c.bf16 %v879_v25, %v878_v24  ;;  %s4934_s4 = sld [smem:[#allocation21_spill]]  ;;  %s4249_s3 = scalar_lea.vmem %s4935_s6, %s4243_s0 }
  0x29   : > { %3701 = vmatpush3.bf16.msra.mxu0 %v3700_v8  ;;  %v1051_v39 = vld [vmem:[%s4249_s3 + $0x30] sm:$0xff]  ;;  %v1052_v40 = vld [vmem:[%s4249_s3 + $0x38] sm:$0xff]  ;;  %v1053_v41 = vld [vmem:[%s4249_s3 + $0x40] sm:$0xff]  ;;  %s4508_s6 = scalar_lea.vmem %s4898_s21, %s4243_s0  ;;  %s4937_s29 = sld [smem:[#allocation16_spill]] }
  0x2a   : > { %3702 = vmatprep.subr.bf16.mxu0 %v3983_v3  ;;  %3713 = vmatpush3.bf16.msra.mxu1 %v3712_v20  ;;  %v1054_v42 = vld [vmem:[%s4249_s3 + $0x48] sm:$0xff]  ;;  %v1055_v43 = vld [vmem:[%s4249_s3 + $0x50] sm:$0xff]  ;;  %v1056_v44 = vld [vmem:[%s4249_s3 + $0x58] sm:$0xff] }
  0x2b   : > { %3714 = vmatprep.subr.bf16.mxu1 %v3983_v3  ;;  %v1057_v45 = vld [vmem:[%s4249_s3 + $0x60] sm:$0xff]  ;;  %v1058_v46 = vld [vmem:[%s4249_s3 + $0x68] sm:$0xff]  ;;  %v1059_v47 = vld [vmem:[%s4249_s3 + $0x70] sm:$0xff] }
  0x2c   : > { %v1060_v48 = vld [vmem:[%s4249_s3 + $0x78] sm:$0xff]  ;;  %v1045_v53 = vld [vmem:[%s4249_s3] sm:$0xff]  ;;  %v1046_v54 = vld [vmem:[%s4249_s3 + $0x8] sm:$0xff] }
  0x2d   : > { %3704 = vmatpush3.bf16.msra.mxu0 %v3703_v13  ;;  %v3151_v30 = vld [vmem:[%s4933_s26] ss:$0 sm:$0xff]  ;;  %v1047_v55 = vld [vmem:[%s4249_s3 + $0x10] sm:$0xff]  ;;  %v1048_v56 = vld [vmem:[%s4249_s3 + $0x18] sm:$0xff]  ;;  %s3986_s26 = smov 96  }
  0x2e   : > { %3705 = vmatprep.subr.bf16.mxu0 %v3983_v3  ;;  %3716 = vmatpush3.bf16.msra.mxu1 %v3715_v23  ;;  %v1061_v38 = vld [vmem:[%s4934_s4] sm:$0xf]  ;;  %v1050_v58 = vld [vmem:[%s4249_s3 + $0x28] sm:$0xff] }
  0x2f   : > { %3717 = vmatprep.subr.bf16.mxu1 %v3983_v3  ;;  %v1049_v57 = vld [vmem:[%s4249_s3 + $0x20] sm:$0xff]  ;;  %s4606_s27 = scalar_lea.vmem %s4937_s29, %s4243_s0  ;;  %s4722_s29 = scalar_lea.vmem %s4897_s20, %s4243_s0 }
  0x30   : > { %v3155_v11 = vld [vmem:[%s4889_s12] ss:$0 sm:$0xff]  ;;  %s4912_s0 = smov 124  }
  0x31   : > { %3707 = vmatpush3.bf16.msra.mxu0 %v3706_v16  ;;  %v3157_v15 = vld [vmem:[%s4885_s8] ss:$0 sm:$0xff] }
  0x32   : > { %3720 = vmatprep.subr.bf16.mxu0 %v3983_v3  ;;  %3719 = vmatpush3.bf16.msra.mxu1 %v3718_v26 }
  0x33   : > { %3758 = vmatprep.subr.msk.mxu1 %vm1118_vm2, %v1061_v38 }
  0x34   : > { %3458 = vmatmul.mubr.msk.f32.vlgmr.msra.gmra.mrb[0].mxu0 %vm797_vm1, %v781_v17 }
  0x35   : > { %3487 = vmatprep.mubr.msk.f32.mxu0 %vm3984_vm0, %v3985_v6  ;;  %3722 = vmatpush3.bf16.msra.mxu0 %v3721_v29 }
  0x36   : > { %3723 = vmatprep.subr.bf16.mxu0 %v3983_v3 }
  0x39   : > { %3725 = vmatpush3.bf16.msra.mxu0 %v3724_v37 }
  0x3a   : > { %3490 = vmatprep.subr.msk.mxu0 %vm1118_vm2, %v1061_v38 }
 0x107   : > { %v867_v31 = vpop.f32.mrb[0].mxu0 }
 0x108   : > { %v868_v32 = vadd.f32 %v3151_v30, %v867_v31  ;;  %v3459_v33 = vpop.f32.mrb[1].mxu0 }
 0x10a   : > { %3813 = vtanh.f32 %v868_v32 }
 0x114   : > { %v3814_v34 = vpop.eup %3813 }
 0x115   : > { %3477 = vmatmul.mubr.msk.f32.vlgmr.msra.gmra.mrb[0].mxu1 %vm797_vm1, %v3814_v34 }
 0x116   : > { %3759 = vmatpush3.msk.msra.mxu1 %vm1118_vm2, %v1061_v38  ;;  %3501 = vmatprep.mubr.msk.f32.mxu1 %vm1069_vm3, %v1051_v39 }
 0x119   : > { %3502 = vmatmul.mubr.msk.f32.vlgmr.msra.gmra.mrb[2].mxu1 %vm1069_vm3, %v1052_v40 }
 0x11a   : > { %3504 = vmatprep.mubr.msk.f32.mxu1 %vm1069_vm3, %v1053_v41 }
 0x11d   : > { %3505 = vmatmul.mubr.msk.f32.gmra.mrb[4].mxu1 %vm1069_vm3, %v1054_v42 }
 0x11e   : > { %3507 = vmatprep.mubr.msk.f32.mxu1 %vm1069_vm3, %v1055_v43 }
 0x121   : > { %3508 = vmatmul.mubr.msk.f32.gmra.mrb[6].mxu1 %vm1069_vm3, %v1056_v44 }
 0x122   : > { %3510 = vmatprep.mubr.msk.f32.mxu1 %vm1069_vm3, %v1057_v45 }
 0x125   : > { %3511 = vmatmul.mubr.msk.f32.gmra.mrb[8].mxu1 %vm1069_vm3, %v1058_v46 }
 0x126   : > { %3513 = vmatprep.mubr.msk.f32.mxu1 %vm1069_vm3, %v1059_v47 }
 0x129   : > { %3514 = vmatmul.mubr.msk.f32.gmra.mrb[10].mxu1 %vm1069_vm3, %v1060_v48 }
 0x1e8   : > { %v956_v50 = vpop.f32.mrb[0].mxu1 }
 0x1e9   : > { %v957_v51 = vadd.f32 %v3153_v49, %v956_v50  ;;  %v3478_v52 = vpop.f32.mrb[1].mxu1 }
 0x1eb   : > { %3488 = vmatmul.mubr.msk.f32.vlgmr.msra.gmra.mrb[2].mxu0 %vm971_vm4, %v957_v51 }
 0x1ec   : > { %3491 = vmatpush3.msk.msra.mxu0 %vm1118_vm2, %v1061_v38  ;;  %3492 = vmatprep.mubr.msk.f32.mxu0 %vm1069_vm3, %v1045_v53  ;;  %v3503_v1 = vpop.f32.mrb[2].mxu1  ;;  %v3175_v38 = vld [vmem:[%s4887_s10] ss:$0 sm:$0xff] }
 0x1ed   : > { %3727 = vmatprep.subr.bf16.mxu0 %v3726_v61  ;;  %v1218_v2 = vpop.f32.mrb[3].mxu1  ;;  %v1224_v30 = vadd.f32 %v3503_v1, %v3157_v15 }
 0x1ee   : > { %v1219_v27 = vadd.f32 %v3157_v15, %v1218_v2 }
 0x1ef   : > { %3493 = vmatmul.mubr.msk.f32.vlgmr.msra.gmra.mrb[4].mxu0 %vm1069_vm3, %v1046_v54 }
 0x1f0   : > { %3495 = vmatprep.mubr.msk.f32.mxu0 %vm1069_vm3, %v1047_v55  ;;  %3729 = vmatpush3.bf16.msra.mxu0 %v3726_v61  ;;  %v3506_v3 = vpop.f32.mrb[4].mxu1 }
 0x1f1   : > { %3731 = vmatprep.subr.bf16.mxu0 %v3730_v0  ;;  %v1228_v4 = vpop.f32.mrb[5].mxu1  ;;  %v1234_v32 = vadd.f32 %v3506_v3, %v3157_v15 }
 0x1f2   : > { %v1229_v29 = vadd.f32 %v3157_v15, %v1228_v4 }
 0x1f3   : > { %3496 = vmatmul.mubr.msk.f32.gmra.mrb[6].mxu0 %vm1069_vm3, %v1048_v56 }
 0x1f4   : > { %3498 = vmatprep.mubr.msk.f32.mxu0 %vm1069_vm3, %v1049_v57  ;;  %3733 = vmatpush3.bf16.msra.mxu0 %v3730_v0  ;;  %v3509_v5 = vpop.f32.mrb[6].mxu1 }
 0x1f5   : > { %v1238_v6 = vpop.f32.mrb[7].mxu1  ;;  %v1244_v34 = vadd.f32 %v3509_v5, %v3157_v15 }
 0x1f6   : > { %v1239_v31 = vadd.f32 %v3157_v15, %v1238_v6 }
 0x1f7   : > { %3499 = vmatmul.mubr.msk.f32.gmra.mrb[8].mxu0 %vm1069_vm3, %v1050_v58 }
 0x1f8   : > { %v3512_v7 = vpop.f32.mrb[8].mxu1 }
 0x1f9   : > { %v1248_v8 = vpop.f32.mrb[9].mxu1  ;;  %v1254_v36 = vadd.f32 %v3512_v7, %v3157_v15 }
 0x1fa   : > { %v1249_v33 = vadd.f32 %v3157_v15, %v1248_v8 }
 0x1fc   : > { %v3515_v9 = vpop.f32.mrb[10].mxu1 }
 0x1fd   : > { %v1258_v10 = vpop.f32.mrb[11].mxu1  ;;  %v1264_v37 = vadd.f32 %v3515_v9, %v3157_v15 }
 0x1fe   : > { %v1259_v35 = vadd.f32 %v3157_v15, %v1258_v10 }
 0x2be   : > { %v1041_v12 = vpop.f32.mrb[2].mxu0 }
 0x2bf   : > { %v4303_v13 = vadd.f32 %v3155_v11, %v1041_v12  ;;  %v3489_v14 = vpop.f32.mrb[3].mxu0 }
 0x2c1   : > { %3548 = vmatprep.subr.msk.mxu1 %vm971_vm4, %v4303_v13 }
 0x2c2   : > { %v3494_v16 = vpop.f32.mrb[4].mxu0  ;;  %3549 = vmatpush3.xpose.msk.msra.mxu1 %vm971_vm4, %v4303_v13 }
 0x2c3   : > { %v1188_v17 = vpop.f32.mrb[5].mxu0  ;;  %v1194_v19 = vadd.f32 %v3494_v16, %v3157_v15 }
 0x2c4   : > { %v1189_v18 = vadd.f32 %v3157_v15, %v1188_v17 }
 0x2c6   : > { %v3497_v20 = vpop.f32.mrb[6].mxu0  ;;  %3524 = vmatprep.mubr.msk.f32.mxu0 %vm971_vm4, %v1189_v18 }
 0x2c7   : > { %v1198_v21 = vpop.f32.mrb[7].mxu0  ;;  %3525 = vmatmul.mubr.msk.f32.vlgmr.msra.gmra.mrb[10].mxu0 %vm971_vm4, %v1194_v19  ;;  %v1204_v23 = vadd.f32 %v3497_v20, %v3157_v15 }
 0x2c8   : > { %v1199_v22 = vadd.f32 %v3157_v15, %v1198_v21 }
 0x2ca   : > { %v3500_v24 = vpop.f32.mrb[8].mxu0  ;;  %3527 = vmatprep.mubr.msk.f32.mxu0 %vm971_vm4, %v1199_v22 }
 0x2cb   : > { %v1208_v25 = vpop.f32.mrb[9].mxu0  ;;  %3528 = vmatmul.mubr.msk.f32.gmra.mrb[12].mxu0 %vm971_vm4, %v1204_v23  ;;  %v1214_v28 = vadd.f32 %v3500_v24, %v3157_v15 }
 0x2cc   : > { %v1209_v26 = vadd.f32 %v3157_v15, %v1208_v25 }
 0x2ce   : > { %3530 = vmatprep.mubr.msk.f32.mxu0 %vm971_vm4, %v1209_v26 }
 0x2cf   : > { %3531 = vmatmul.mubr.msk.f32.gmra.mrb[14].mxu0 %vm971_vm4, %v1214_v28 }
 0x2d0   : > { %3533 = vmatprep.mubr.msk.f32.mxu0 %vm971_vm4, %v1219_v27 }
 0x2d3   : > { %3534 = vmatmul.mubr.msk.f32.gmra.mrb[16].mxu0 %vm971_vm4, %v1224_v30 }
 0x2d4   : > { %3536 = vmatprep.mubr.msk.f32.mxu0 %vm971_vm4, %v1229_v29 }
 0x2d7   : > { %3537 = vmatmul.mubr.msk.f32.gmra.mrb[18].mxu0 %vm971_vm4, %v1234_v32 }
 0x2d8   : > { %3539 = vmatprep.mubr.msk.f32.mxu0 %vm971_vm4, %v1239_v31 }
 0x2db   : > { %3540 = vmatmul.mubr.msk.f32.gmra.mrb[20].mxu0 %vm971_vm4, %v1244_v34 }
 0x2dc   : > { %3542 = vmatprep.mubr.msk.f32.mxu0 %vm971_vm4, %v1249_v33 }
 0x2df   : > { %3543 = vmatmul.mubr.msk.f32.gmra.mrb[22].mxu0 %vm971_vm4, %v1254_v36 }
 0x2e0   : > { %3545 = vmatprep.mubr.msk.f32.mxu0 %vm971_vm4, %v1259_v35 }
 0x2e3   : > { %3546 = vmatmul.mubr.msk.f32.gmra.mrb[24].mxu0 %vm971_vm4, %v1264_v37 }
 0x39a   : > { %v3526_v39 = vpop.f32.mrb[10].mxu0 }
 0x39b   : > { %v1392_v40 = vpop.f32.mrb[11].mxu0  ;;  %v1398_v42 = vadd.f32 %v3526_v39, %v3175_v38 }
 0x39c   : > { %v1393_v41 = vadd.f32 %v3175_v38, %v1392_v40 }
 0x39e   : > { %v3529_v43 = vpop.f32.mrb[12].mxu0  ;;  %3550 = vmatprep.mubr.msk.f32.mxu1 %vm971_vm4, %v1393_v41 }
 0x39f   : > { %v1402_v44 = vpop.f32.mrb[13].mxu0  ;;  %3551 = vmatmul.mubr.msk.f32.vlgmr.msra.gmra.mrb[12].mxu1 %vm971_vm4, %v1398_v42  ;;  %v1408_v46 = vadd.f32 %v3529_v43, %v3175_v38 }
 0x3a0   : > { %v1403_v45 = vadd.f32 %v3175_v38, %v1402_v44 }
 0x3a2   : > { %v3532_v47 = vpop.f32.mrb[14].mxu0  ;;  %3553 = vmatprep.mubr.msk.f32.mxu1 %vm971_vm4, %v1403_v45 }
 0x3a3   : > { %v1412_v48 = vpop.f32.mrb[15].mxu0  ;;  %3554 = vmatmul.mubr.msk.f32.gmra.mrb[14].mxu1 %vm971_vm4, %v1408_v46  ;;  %v1418_v50 = vadd.f32 %v3532_v47, %v3175_v38 }
 0x3a4   : > { %v1413_v49 = vadd.f32 %v3175_v38, %v1412_v48 }
 0x3a6   : > { %v3535_v51 = vpop.f32.mrb[16].mxu0  ;;  %3556 = vmatprep.mubr.msk.f32.mxu1 %vm971_vm4, %v1413_v49 }
 0x3a7   : > { %v1422_v52 = vpop.f32.mrb[17].mxu0  ;;  %3557 = vmatmul.mubr.msk.f32.gmra.mrb[16].mxu1 %vm971_vm4, %v1418_v50  ;;  %v1428_v54 = vadd.f32 %v3535_v51, %v3175_v38 }
 0x3a8   : > { %v1423_v53 = vadd.f32 %v3175_v38, %v1422_v52 }
 0x3aa   : > { %v3538_v55 = vpop.f32.mrb[18].mxu0  ;;  %3559 = vmatprep.mubr.msk.f32.mxu1 %vm971_vm4, %v1423_v53 }
 0x3ab   : > { %v1432_v56 = vpop.f32.mrb[19].mxu0  ;;  %3560 = vmatmul.mubr.msk.f32.gmra.mrb[18].mxu1 %vm971_vm4, %v1428_v54  ;;  %v1438_v58 = vadd.f32 %v3538_v55, %v3175_v38 }
 0x3ac   : > { %v1433_v57 = vadd.f32 %v3175_v38, %v1432_v56 }
 0x3ae   : > { %v3541_v59 = vpop.f32.mrb[20].mxu0  ;;  %3562 = vmatprep.mubr.msk.f32.mxu1 %vm971_vm4, %v1433_v57 }
 0x3af   : > { %v1442_v60 = vpop.f32.mrb[21].mxu0  ;;  %3563 = vmatmul.mubr.msk.f32.gmra.mrb[20].mxu1 %vm971_vm4, %v1438_v58  ;;  %v1448_v62 = vadd.f32 %v3541_v59, %v3175_v38 }
 0x3b0   : > { %v1443_v61 = vadd.f32 %v3175_v38, %v1442_v60 }
 0x3b2   : > { %v3544_v63 = vpop.f32.mrb[22].mxu0  ;;  %3565 = vmatprep.mubr.msk.f32.mxu1 %vm971_vm4, %v1443_v61 }
 0x3b3   : > { %v1452_v0 = vpop.f32.mrb[23].mxu0  ;;  %3566 = vmatmul.mubr.msk.f32.gmra.mrb[22].mxu1 %vm971_vm4, %v1448_v62  ;;  %v1458_v2 = vadd.f32 %v3544_v63, %v3175_v38 }
 0x3b4   : > { %v1453_v1 = vadd.f32 %v3175_v38, %v1452_v0 }
 0x3b6   : > { %v3547_v3 = vpop.f32.mrb[24].mxu0  ;;  %3568 = vmatprep.mubr.msk.f32.mxu1 %vm971_vm4, %v1453_v1 }
 0x3b7   : > { %v1468_v4 = vadd.f32 %v3547_v3, %v3175_v38  ;;  %v1462_v5 = vpop.f32.mrb[25].mxu0  ;;  %3569 = vmatmul.mubr.msk.f32.gmra.mrb[24].mxu1 %vm971_vm4, %v1458_v2 }
 0x3b8   : > { %v1463_v6 = vadd.f32 %v3175_v38, %v1462_v5 }
 0x3ba   : > { %3571 = vmatprep.mubr.msk.f32.mxu1 %vm971_vm4, %v1463_v6 }
 0x3bb   : > { %3572 = vmatmul.mubr.msk.f32.gmra.mrb[26].mxu1 %vm971_vm4, %v1468_v4 }
 0x472   : > { %v3552_v7 = vpop.f32.mrb[12].mxu1 }
 0x473   : > { %v1588_v8 = vpop.f32.mrb[13].mxu1  ;;  %v4349_v10 = vmul.f32 0.17677669, %v3552_v7 }
 0x474   : > { %v4347_v9 = vmul.f32 0.17677669, %v1588_v8 }
 0x475   : > { %v1687_v18 = vsel %vm1683_vm5, %v4349_v10, -inf }
 0x476   : > { %v3555_v11 = vpop.f32.mrb[14].mxu1  ;;  %v1684_v12 = vsel %vm1683_vm5, %v4347_v9, -inf }
 0x477   : > { %1685 = vmax.xlane.f32.xlu0 %v1684_v12  ;;  %v1598_v14 = vpop.f32.mrb[15].mxu1  ;;  %v4355_v16 = vmul.f32 0.17677669, %v3555_v11 }
 0x478   : > { %v4353_v15 = vmul.f32 0.17677669, %v1598_v14 }
 0x479   : > { %v1693_v24 = vsel %vm1683_vm5, %v4355_v16, -inf }
 0x47a   : > { %v3558_v17 = vpop.f32.mrb[16].mxu1  ;;  %v1690_v19 = vsel %vm1683_vm5, %v4353_v15, -inf }
 0x47b   : > { %1688 = vmax.xlane.f32.xlu0 %v1687_v18  ;;  %1691 = vmax.xlane.f32.xlu1 %v1690_v19  ;;  %v1608_v20 = vpop.f32.mrb[17].mxu1  ;;  %v4363_v22 = vmul.f32 0.17677669, %v3558_v17 }
 0x47c   : > { %v4361_v21 = vmul.f32 0.17677669, %v1608_v20 }
 0x47d   : > { %v1699_v30 = vsel %vm1683_vm5, %v4363_v22, -inf }
 0x47e   : > { %v3561_v23 = vpop.f32.mrb[18].mxu1  ;;  %v1696_v25 = vsel %vm1683_vm5, %v4361_v21, -inf }
 0x47f   : > { %1694 = vmax.xlane.f32.xlu1 %v1693_v24  ;;  %1697 = vmax.xlane.f32.xlu0 %v1696_v25  ;;  %v1618_v26 = vpop.f32.mrb[19].mxu1  ;;  %v4371_v28 = vmul.f32 0.17677669, %v3561_v23 }
 0x480   : > { %v4369_v27 = vmul.f32 0.17677669, %v1618_v26 }
 0x481   : > { %v1705_v36 = vsel %vm1683_vm5, %v4371_v28, -inf }
 0x482   : > { %v3564_v29 = vpop.f32.mrb[20].mxu1  ;;  %v1702_v31 = vsel %vm1683_vm5, %v4369_v27, -inf }
 0x483   : > { %1700 = vmax.xlane.f32.xlu1 %v1699_v30  ;;  %1703 = vmax.xlane.f32.xlu0 %v1702_v31  ;;  %v1628_v32 = vpop.f32.mrb[21].mxu1  ;;  %v4379_v34 = vmul.f32 0.17677669, %v3564_v29 }
 0x484   : > { %v4377_v33 = vmul.f32 0.17677669, %v1628_v32 }
 0x485   : > { %v1711_v42 = vsel %vm1683_vm5, %v4379_v34, -inf }
 0x486   : > { %v3567_v35 = vpop.f32.mrb[22].mxu1  ;;  %v1708_v37 = vsel %vm1683_vm5, %v4377_v33, -inf }
 0x487   : > { %1706 = vmax.xlane.f32.xlu1 %v1705_v36  ;;  %1709 = vmax.xlane.f32.xlu0 %v1708_v37  ;;  %v1638_v38 = vpop.f32.mrb[23].mxu1  ;;  %v4387_v40 = vmul.f32 0.17677669, %v3567_v35 }
 0x488   : > { %v4385_v39 = vmul.f32 0.17677669, %v1638_v38 }
 0x489   : > { %v1717_v48 = vsel %vm1683_vm5, %v4387_v40, -inf }
 0x48a   : > { %v3570_v41 = vpop.f32.mrb[24].mxu1  ;;  %v1714_v43 = vsel %vm1683_vm5, %v4385_v39, -inf }
 0x48b   : > { %1712 = vmax.xlane.f32.xlu1 %v1711_v42  ;;  %1715 = vmax.xlane.f32.xlu0 %v1714_v43  ;;  %v1648_v44 = vpop.f32.mrb[25].mxu1  ;;  %v4395_v46 = vmul.f32 0.17677669, %v3570_v41 }
 0x48c   : > { %v4393_v45 = vmul.f32 0.17677669, %v1648_v44 }
 0x48d   : > { %v1723_v53 = vsel %vm1683_vm5, %v4395_v46, -inf }
 0x48e   : > { %v3573_v47 = vpop.f32.mrb[26].mxu1  ;;  %v1720_v49 = vsel %vm1683_vm5, %v4393_v45, -inf }
 0x48f   : > { %1718 = vmax.xlane.f32.xlu1 %v1717_v48  ;;  %1721 = vmax.xlane.f32.xlu0 %v1720_v49  ;;  %v1658_v50 = vpop.f32.mrb[27].mxu1  ;;  %v4401_v51 = vmul.f32 0.17677669, %v3573_v47 }
 0x490   : > { %v4403_v52 = vmul.f32 0.17677669, %v1658_v50 }
 0x491   : > { %v1729_v55 = vsel %vm1683_vm5, %v4401_v51, -inf }
 0x492   : > { %v1726_v54 = vsel %vm1683_vm5, %v4403_v52, -inf }
 0x493   : > { %1724 = vmax.xlane.f32.xlu1 %v1723_v53  ;;  %1727 = vmax.xlane.f32.xlu0 %v1726_v54 }
 0x497   : > { %1730 = vmax.xlane.f32.xlu1 %v1729_v55 }
 0x504   : > { %v1686_v56 = vpop.xlane.xlu0 %1685 }
 0x505   : > { %v1732_v57 = vsub.f32 %v4347_v9, %v1686_v56 }
 0x507   : > { %v1748_v58 = vmul.f32 1.442695, %v1732_v57 }
 0x508   : > { %v1689_v59 = vpop.xlane.xlu0 %1688  ;;  %v1692_v60 = vpop.xlane.xlu1 %1691 }
 0x509   : > { %3815 = vpow2.f32 %v1748_v58  ;;  %v1733_v61 = vsub.f32 %v4349_v10, %v1689_v59  ;;  %v1734_v62 = vsub.f32 %v4353_v15, %v1692_v60 }
 0x50b   : > { %v1750_v63 = vmul.f32 1.442695, %v1733_v61  ;;  %v1752_v0 = vmul.f32 1.442695, %v1734_v62 }
 0x50c   : > { %v1695_v1 = vpop.xlane.xlu1 %1694  ;;  %v1698_v2 = vpop.xlane.xlu0 %1697 }
 0x50d   : > { %3817 = vpow2.f32 %v1750_v63  ;;  %v1735_v3 = vsub.f32 %v4355_v16, %v1695_v1  ;;  %v1736_v4 = vsub.f32 %v4361_v21, %v1698_v2 }
 0x50e   : > { %3819 = vpow2.f32 %v1752_v0 }
 0x50f   : > { %v1754_v5 = vmul.f32 1.442695, %v1735_v3  ;;  %v1756_v6 = vmul.f32 1.442695, %v1736_v4 }
 0x510   : > { %v1701_v7 = vpop.xlane.xlu1 %1700  ;;  %v1704_v8 = vpop.xlane.xlu0 %1703 }
 0x511   : > { %3821 = vpow2.f32 %v1754_v5  ;;  %v1737_v9 = vsub.f32 %v4363_v22, %v1701_v7  ;;  %v1738_v10 = vsub.f32 %v4369_v27, %v1704_v8 }
 0x512   : > { %3823 = vpow2.f32 %v1756_v6 }
 0x513   : > { %v4418_v11 = vpop.eup %3815  ;;  %v1758_v12 = vmul.f32 1.442695, %v1737_v9  ;;  %v1760_v14 = vmul.f32 1.442695, %v1738_v10  ;;  %v2072_v9 = vld [vmem:[%s4890_s13] sm:$0xff]  ;;  %v2073_v10 = vld [vmem:[%s4890_s13 + $0x8] sm:$0xff] }
 0x514   : > { %v1707_v15 = vpop.xlane.xlu1 %1706  ;;  %v1710_v17 = vpop.xlane.xlu0 %1709  ;;  %v1780_v16 = vsel %vm1683_vm5, %v4418_v11, 0.0 }
 0x515   : > { %3825 = vpow2.f32 %v1758_v12  ;;  %v1739_v18 = vsub.f32 %v4371_v28, %v1707_v15  ;;  %v1740_v19 = vsub.f32 %v4377_v33, %v1710_v17  ;;  %1781 = vadd.xlane.f32.xlu0 %v1780_v16  ;;  %v2074_v12 = vld [vmem:[%s4890_s13 + $0x10] sm:$0xff]  ;;  %v2075_v15 = vld [vmem:[%s4890_s13 + $0x18] sm:$0xff] }
 0x516   : > { %3827 = vpow2.f32 %v1760_v14  ;;  %v3734_v14 = vpack.c.bf16 %v2073_v10, %v2072_v9  ;;  %v3738_v17 = vpack.c.bf16 %v2075_v15, %v2074_v12 }
 0x517   : > { %v4424_v20 = vpop.eup %3817  ;;  %v1762_v21 = vmul.f32 1.442695, %v1739_v18  ;;  %v1764_v22 = vmul.f32 1.442695, %v1740_v19 }
 0x518   : > { %v4426_v23 = vpop.eup %3819  ;;  %v1713_v24 = vpop.xlane.xlu1 %1712  ;;  %v1783_v26 = vsel %vm1683_vm5, %v4424_v20, 0.0  ;;  %3735 = vmatprep.subr.bf16.mxu1 %v3734_v14 }
 0x519   : > { %v1716_v25 = vpop.xlane.xlu0 %1715  ;;  %3829 = vpow2.f32 %v1762_v21  ;;  %v1741_v27 = vsub.f32 %v4379_v34, %v1713_v24  ;;  %1784 = vadd.xlane.f32.xlu1 %v1783_v26  ;;  %v1786_v29 = vsel %vm1683_vm5, %v4426_v23, 0.0  ;;  %3737 = vmatpush3.bf16.msra.mxu1 %v3734_v14 }
 0x51a   : > { %v1742_v28 = vsub.f32 %v4385_v39, %v1716_v25  ;;  %3831 = vpow2.f32 %v1764_v22  ;;  %1787 = vadd.xlane.f32.xlu0 %v1786_v29  ;;  %3739 = vmatprep.subr.bf16.mxu1 %v3738_v17 }
 0x51b   : > { %v4434_v30 = vpop.eup %3821  ;;  %v1766_v31 = vmul.f32 1.442695, %v1741_v27 }
 0x51c   : > { %v1768_v32 = vmul.f32 1.442695, %v1742_v28  ;;  %v4436_v33 = vpop.eup %3823  ;;  %v1719_v35 = vpop.xlane.xlu1 %1718  ;;  %v1789_v37 = vsel %vm1683_vm5, %v4434_v30, 0.0 }
 0x51d   : > { %v1722_v36 = vpop.xlane.xlu0 %1721  ;;  %3833 = vpow2.f32 %v1766_v31  ;;  %v1743_v34 = vsub.f32 %v4387_v40, %v1719_v35  ;;  %1790 = vadd.xlane.f32.xlu1 %v1789_v37  ;;  %v1792_v39 = vsel %vm1683_vm5, %v4436_v33, 0.0  ;;  %3741 = vmatpush3.bf16.msra.mxu1 %v3738_v17 }
 0x51e   : > { %v1744_v38 = vsub.f32 %v4393_v45, %v1722_v36  ;;  %3835 = vpow2.f32 %v1768_v32  ;;  %1793 = vadd.xlane.f32.xlu0 %v1792_v39 }
 0x51f   : > { %v4444_v41 = vpop.eup %3825  ;;  %v1770_v42 = vmul.f32 1.442695, %v1743_v34 }
 0x520   : > { %v1772_v43 = vmul.f32 1.442695, %v1744_v38  ;;  %v4446_v44 = vpop.eup %3827  ;;  %v1725_v47 = vpop.xlane.xlu1 %1724  ;;  %v1795_v49 = vsel %vm1683_vm5, %v4444_v41, 0.0 }
 0x521   : > { %v1728_v48 = vpop.xlane.xlu0 %1727  ;;  %3837 = vpow2.f32 %v1770_v42  ;;  %v1745_v40 = vsub.f32 %v4395_v46, %v1725_v47  ;;  %1796 = vadd.xlane.f32.xlu1 %v1795_v49  ;;  %v1798_v50 = vsel %vm1683_vm5, %v4446_v44, 0.0 }
 0x522   : > { %v1746_v45 = vsub.f32 %v4403_v52, %v1728_v48  ;;  %3839 = vpow2.f32 %v1772_v43  ;;  %1799 = vadd.xlane.f32.xlu0 %v1798_v50 }
 0x523   : > { %v4454_v53 = vpop.eup %3829  ;;  %v1774_v54 = vmul.f32 1.442695, %v1745_v40 }
 0x524   : > { %v1776_v55 = vmul.f32 1.442695, %v1746_v45  ;;  %v4456_v56 = vpop.eup %3831  ;;  %v1731_v57 = vpop.xlane.xlu1 %1730  ;;  %v1801_v58 = vsel %vm1683_vm5, %v4454_v53, 0.0 }
 0x525   : > { %3841 = vpow2.f32 %v1774_v54  ;;  %v1747_v46 = vsub.f32 %v4401_v51, %v1731_v57  ;;  %1802 = vadd.xlane.f32.xlu1 %v1801_v58  ;;  %v1804_v52 = vsel %vm1683_vm5, %v4456_v56, 0.0 }
 0x526   : > { %1805 = vadd.xlane.f32.xlu0 %v1804_v52  ;;  %3843 = vpow2.f32 %v1776_v55 }
 0x527   : > { %v4463_v59 = vpop.eup %3833  ;;  %v1778_v60 = vmul.f32 1.442695, %v1747_v46 }
 0x528   : > { %v4465_v61 = vpop.eup %3835  ;;  %v1807_v62 = vsel %vm1683_vm5, %v4463_v59, 0.0 }
 0x529   : > { %1808 = vadd.xlane.f32.xlu1 %v1807_v62  ;;  %v1810_v63 = vsel %vm1683_vm5, %v4465_v61, 0.0  ;;  %3845 = vpow2.f32 %v1778_v60 }
 0x52a   : > { %1811 = vadd.xlane.f32.xlu0 %v1810_v63 }
 0x52b   : > { %v4471_v51 = vpop.eup %3837 }
 0x52c   : > { %v4473_v0 = vpop.eup %3839  ;;  %v1813_v1 = vsel %vm1683_vm5, %v4471_v51, 0.0 }
 0x52d   : > { %1814 = vadd.xlane.f32.xlu1 %v1813_v1  ;;  %v1816_v2 = vsel %vm1683_vm5, %v4473_v0, 0.0  ;;  %v2277_v1 = vld [vmem:[%s4892_s15 + $0x8] sm:$0xff] }
 0x52e   : > { %1817 = vadd.xlane.f32.xlu0 %v1816_v2 }
 0x52f   : > { %v4479_v3 = vpop.eup %3841 }
 0x530   : > { %v1819_v4 = vsel %vm1683_vm5, %v4479_v3, 0.0  ;;  %v4483_v5 = vpop.eup %3843 }
 0x531   : > { %1820 = vadd.xlane.f32.xlu1 %v1819_v4  ;;  %v1822_v6 = vsel %vm1683_vm5, %v4483_v5, 0.0 }
 0x533   : > { %v4487_v7 = vpop.eup %3845 }
 0x534   : > { %v1825_v8 = vsel %vm1683_vm5, %v4487_v7, 0.0 }
 0x535   : > { %1823 = vadd.xlane.f32.xlu1 %v1822_v6 }
 0x539   : > { %1826 = vadd.xlane.f32.xlu1 %v1825_v8 }
 0x544   : > { %1876 = vrot.lane.b32.xlu0 %v4303_v13, %s3986_s26  ;;  %s4804_s26 = scalar_lea.hbm %s4899_s22, %s4913_s28 }
 0x5a2   : > { %v1782_v13 = vpop.xlane.xlu0 %1781 }
 0x5a3   : > { %3847 = vrcp.f32 %v1782_v13 }
 0x5a6   : > { %v1785_v16 = vpop.xlane.xlu1 %1784 }
 0x5a7   : > { %3849 = vrcp.f32 %v1785_v16  ;;  %v1788_v18 = vpop.xlane.xlu0 %1787 }
 0x5a8   : > { %3851 = vrcp.f32 %v1788_v18 }
 0x5aa   : > { %v1791_v19 = vpop.xlane.xlu1 %1790 }
 0x5ab   : > { %3853 = vrcp.f32 %v1791_v19  ;;  %v1794_v21 = vpop.xlane.xlu0 %1793 }
 0x5ac   : > { %3855 = vrcp.f32 %v1794_v21  ;;  %v2278_v21 = vld [vmem:[%s4892_s15 + $0x10] sm:$0xff] }
 0x5ad   : > { %v3848_v22 = vpop.eup %3847 }
 0x5ae   : > { %v1797_v24 = vpop.xlane.xlu1 %1796  ;;  %v1829_v25 = vmul.f32 %v3848_v22, %v4418_v11  ;;  %v2279_v22 = vld [vmem:[%s4892_s15 + $0x18] sm:$0xff] }
 0x5af   : > { %3857 = vrcp.f32 %v1797_v24  ;;  %v1800_v26 = vpop.xlane.xlu0 %1799  ;;  %v3746_v24 = vpack.c.bf16 %v2279_v22, %v2278_v21  ;;  %v4658_v22 = vld [vmem:[%s4893_s16] ss:$0 sm:$0xff] }
 0x5b0   : > { %3859 = vrcp.f32 %v1800_v26  ;;  %1860 = vst.msk [vmem:[%s4508_s6] sm:$0xff] %vm1683_vm5, %v1829_v25  ;;  %3576 = vmatprep.mubr.msk.f32.mxu0 %vm1683_vm5, %v1829_v25  ;;  %v2280_v25 = vld [vmem:[%s4606_s27] sm:$0xff]  ;;  %v2281_v26 = vld [vmem:[%s4606_s27 + $0x8] sm:$0xff] }
 0x5b1   : > { %v3850_v27 = vpop.eup %3849 }
 0x5b2   : > { %v3852_v28 = vpop.eup %3851  ;;  %v1831_v29 = vmul.f32 %v3850_v27, %v4424_v20  ;;  %v1803_v31 = vpop.xlane.xlu1 %1802  ;;  %v3987_v27 = vmov 0  }
 0x5b3   : > { %3861 = vrcp.f32 %v1803_v31  ;;  %v1806_v32 = vpop.xlane.xlu0 %1805  ;;  %v1833_v35 = vmul.f32 %v3852_v28, %v4426_v23  ;;  %3811 = vset.pattern.permute.xlu1 %v3987_v27  ;;  %3812 = vset.pattern.permute.xlu0 %v3987_v27  ;;  %v2282_v28 = vld [vmem:[%s4606_s27 + $0x10] sm:$0xff]  ;;  %v2615_v31 = vld [vmem:[%s4895_s18] sm:$0xff] }
 0x5b4   : > { %1861 = vst.msk [vmem:[%s4508_s6 + $0x8] sm:$0xff] %vm1683_vm5, %v1831_v29  ;;  %3863 = vrcp.f32 %v1806_v32  ;;  %2299 = vperm.xlu1 %3811, %v2280_v25   ;;  %2304 = vperm.xlu0 %3812, %v2281_v26   ;;  %v2616_v32 = vld [vmem:[%s4895_s18 + $0x8] sm:$0xff] }
 0x5b5   : > { %v3854_v11 = vpop.eup %3853  ;;  %1862 = vst.msk [vmem:[%s4508_s6 + $0x10] sm:$0xff] %vm1683_vm5, %v1833_v35 }
 0x5b6   : > { %v3856_v36 = vpop.eup %3855  ;;  %v1809_v37 = vpop.xlane.xlu1 %1808  ;;  %v1835_v34 = vmul.f32 %v3854_v11, %v4434_v30  ;;  %v2286_v11 = vld [vmem:[%s4606_s27 + $0x30] sm:$0xff] }
 0x5b7   : > { %3865 = vrcp.f32 %v1809_v37  ;;  %v1812_v20 = vpop.xlane.xlu0 %1811  ;;  %v1837_v38 = vmul.f32 %v3856_v36, %v4436_v33  ;;  %v3750_v36 = vpack.c.bf16 %v2616_v32, %v2615_v31  ;;  %v2285_v37 = vld [vmem:[%s4606_s27 + $0x28] sm:$0xff] }
 0x5b8   : > { %3867 = vrcp.f32 %v1812_v20  ;;  %1863 = vst.msk [vmem:[%s4508_s6 + $0x18] sm:$0xff] %vm1683_vm5, %v1835_v34  ;;  %2309 = vperm.xlu1 %3811, %v2282_v28   ;;  %v2287_v20 = vld [vmem:[%s4606_s27 + $0x38] sm:$0xff] }
 0x5b9   : > { %v3858_v23 = vpop.eup %3857  ;;  %1864 = vst.msk [vmem:[%s4508_s6 + $0x20] sm:$0xff] %vm1683_vm5, %v1837_v38  ;;  %3751 = vmatprep.subr.bf16.mxu1 %v3750_v36 }
 0x5ba   : > { %v3860_v39 = vpop.eup %3859  ;;  %v1815_v42 = vpop.xlane.xlu1 %1814  ;;  %v1839_v43 = vmul.f32 %v3858_v23, %v4444_v41  ;;  %v2289_v23 = vld [vmem:[%s4606_s27 + $0x48] sm:$0xff] }
 0x5bb   : > { %3869 = vrcp.f32 %v1815_v42  ;;  %v1818_v47 = vpop.xlane.xlu0 %1817  ;;  %v1841_v30 = vmul.f32 %v3860_v39, %v4446_v44  ;;  %v2292_v39 = vld [vmem:[%s4606_s27 + $0x60] sm:$0xff]  ;;  %v2291_v42 = vld [vmem:[%s4606_s27 + $0x58] sm:$0xff] }
 0x5bc   : > { %3871 = vrcp.f32 %v1818_v47  ;;  %1865 = vst.msk [vmem:[%s4508_s6 + $0x28] sm:$0xff] %vm1683_vm5, %v1839_v43  ;;  %v2293_v47 = vld [vmem:[%s4606_s27 + $0x68] sm:$0xff] }
 0x5bd   : > { %v3862_v33 = vpop.eup %3861  ;;  %1866 = vst.msk [vmem:[%s4508_s6 + $0x30] sm:$0xff] %vm1683_vm5, %v1841_v30 }
 0x5be   : > { %v3864_v48 = vpop.eup %3863  ;;  %v1821_v49 = vpop.xlane.xlu1 %1820  ;;  %v1843_v40 = vmul.f32 %v3862_v33, %v4454_v53  ;;  %v3225_v33 = vld [vmem:[%s4891_s14] ss:$0 sm:$0xff] }
 0x5bf   : > { %3873 = vrcp.f32 %v1821_v49  ;;  %v1877_v45 = vpop.permute.xlu0 %1876  ;;  %v1845_v41 = vmul.f32 %v3864_v48, %v4456_v56 }
 0x5c0   : > { %3574 = vmatprep.subr.mxu0 %v1877_v45  ;;  %1867 = vst.msk [vmem:[%s4508_s6 + $0x38] sm:$0xff] %vm1683_vm5, %v1843_v40 }
 0x5c1   : > { %v3866_v44 = vpop.eup %3865  ;;  %3575 = vmatpush3.msra.mxu0 %v1877_v45  ;;  %1868 = vst.msk [vmem:[%s4508_s6 + $0x40] sm:$0xff] %vm1683_vm5, %v1845_v41 }
 0x5c2   : > { %v3868_v50 = vpop.eup %3867  ;;  %3577 = vmatmul.mubr.msk.f32.vlgmr.msra.gmra.mrb[26].mxu0 %vm1683_vm5, %v1831_v29  ;;  %v1824_v54 = vpop.xlane.xlu1 %1823  ;;  %v1847_v53 = vmul.f32 %v3866_v44, %v4463_v59  ;;  %v2284_v29 = vld [vmem:[%s4606_s27 + $0x20] sm:$0xff] }
 0x5c3   : > { %3875 = vrcp.f32 %v1824_v54  ;;  %3579 = vmatprep.mubr.msk.f32.mxu0 %vm1683_vm5, %v1833_v35  ;;  %v1849_v55 = vmul.f32 %v3868_v50, %v4465_v61  ;;  %2319 = vperm.xlu0 %3812, %v2284_v29   ;;  %v2283_v35 = vld [vmem:[%s4606_s27 + $0x18] sm:$0xff]  ;;  %v4665_v29 = vld [vmem:[%s4894_s17] ss:$0 sm:$0xff] }
 0x5c4   : > { %1869 = vst.msk [vmem:[%s4508_s6 + $0x48] sm:$0xff] %vm1683_vm5, %v1847_v53  ;;  %2314 = vperm.xlu1 %3811, %v2283_v35  }
 0x5c5   : > { %v3870_v56 = vpop.eup %3869  ;;  %1870 = vst.msk [vmem:[%s4508_s6 + $0x50] sm:$0xff] %vm1683_vm5, %v1849_v55 }
 0x5c6   : > { %v3872_v57 = vpop.eup %3871  ;;  %3580 = vmatmul.mubr.msk.f32.gmra.mrb[28].mxu0 %vm1683_vm5, %v1835_v34  ;;  %v1827_v58 = vpop.xlane.xlu1 %1826  ;;  %v1851_v46 = vmul.f32 %v3870_v56, %v4471_v51  ;;  %v2288_v34 = vld [vmem:[%s4606_s27 + $0x40] sm:$0xff] }
 0x5c7   : > { %3877 = vrcp.f32 %v1827_v58  ;;  %3582 = vmatprep.mubr.msk.f32.mxu0 %vm1683_vm5, %v1837_v38  ;;  %v1853_v52 = vmul.f32 %v3872_v57, %v4473_v0  ;;  %v2276_v0 = vld [vmem:[%s4892_s15] sm:$0xff]  ;;  %2329 = vperm.xlu0 %3812, %v2286_v11   ;;  %v2290_v38 = vld [vmem:[%s4606_s27 + $0x50] sm:$0xff] }
 0x5c8   : > { %1871 = vst.msk [vmem:[%s4508_s6 + $0x58] sm:$0xff] %vm1683_vm5, %v1851_v46  ;;  %v3742_v2 = vpack.c.bf16 %v2277_v1, %v2276_v0  ;;  %2324 = vperm.xlu1 %3811, %v2285_v37  }
 0x5c9   : > { %v3874_v59 = vpop.eup %3873  ;;  %1872 = vst.msk [vmem:[%s4508_s6 + $0x60] sm:$0xff] %vm1683_vm5, %v1853_v52 }
 0x5ca   : > { %3583 = vmatmul.mubr.msk.f32.gmra.mrb[30].mxu0 %vm1683_vm5, %v1839_v43  ;;  %v1855_v60 = vmul.f32 %v3874_v59, %v4479_v3  ;;  %3743 = vmatprep.subr.bf16.mxu0 %v3742_v2  ;;  %v2294_v43 = vld [vmem:[%s4606_s27 + $0x70] sm:$0xff] }
 0x5cb   : > { %3585 = vmatprep.mubr.msk.f32.mxu0 %vm1683_vm5, %v1841_v30  ;;  %3745 = vmatpush3.bf16.msra.mxu0 %v3742_v2  ;;  %v2295_v30 = vld [vmem:[%s4606_s27 + $0x78] sm:$0xff]  ;;  %s4790_s27 = sand.u32 1, %s3973_s30  }
 0x5cc   : > { %1873 = vst.msk [vmem:[%s4508_s6 + $0x68] sm:$0xff] %vm1683_vm5, %v1855_v60  ;;  %3747 = vmatprep.subr.bf16.mxu0 %v3746_v24  ;;  %2339 = vperm.xlu0 %3812, %v2288_v34   ;;  %s4910_s3 = sshll.u32 %s4790_s27, 1 }
 0x5cd   : > { %v3876_v61 = vpop.eup %3875  ;;  %2334 = vperm.xlu1 %3811, %v2287_v20   ;;  %s749_s2 = scalar_lea.vmem [#allocation2], %s4910_s3 }
 0x5ce   : > { %3586 = vmatmul.mubr.msk.f32.gmra.mrb[32].mxu0 %vm1683_vm5, %v1843_v40  ;;  %v1857_v62 = vmul.f32 %v3876_v61, %v4483_v5 }
 0x5cf   : > { %3588 = vmatprep.mubr.msk.f32.mxu0 %vm1683_vm5, %v1845_v41  ;;  %3749 = vmatpush3.bf16.msra.mxu0 %v3746_v24 }
 0x5d0   : > { %1874 = vst.msk [vmem:[%s4508_s6 + $0x70] sm:$0xff] %vm1683_vm5, %v1857_v62  ;;  %2349 = vperm.xlu0 %3812, %v2290_v38  }
 0x5d1   : > { %v3878_v63 = vpop.eup %3877  ;;  %2344 = vperm.xlu1 %3811, %v2289_v23  }
 0x5d2   : > { %3589 = vmatmul.mubr.msk.f32.gmra.mrb[34].mxu0 %vm1683_vm5, %v1847_v53  ;;  %v1859_v51 = vmul.f32 %v3878_v63, %v4487_v7 }
 0x5d3   : > { %3591 = vmatprep.mubr.msk.f32.mxu0 %vm1683_vm5, %v1849_v55 }
 0x5d4   : > { %1875 = vst.msk [vmem:[%s4508_s6 + $0x78] sm:$0xff] %vm1683_vm5, %v1859_v51  ;;  %2359 = vperm.xlu0 %3812, %v2292_v39   ;;  %s2958_s6 = sshll.u32 %s749_s2, 4  ;;  %s2959_s6 = int_to_ptr.vmem [resolvable:$true] %s2958_s6 }
 0x5d5   : > { %2354 = vperm.xlu1 %3811, %v2291_v42   ;;  %s3887_s3 = scalar_lea.vmem %s2959_s6, 32 }
 0x5d6   : > { %3592 = vmatmul.mubr.msk.f32.gmra.mrb[36].mxu0 %vm1683_vm5, %v1851_v46  ;;  %p3888_p11 = scmp.ne.s32.totalorder %s2959_s6, %s3887_s3 }
 0x5d7   : > { %3594 = vmatprep.mubr.msk.f32.mxu0 %vm1683_vm5, %v1853_v52 }
 0x5d8   : > { %2369 = vperm.xlu0 %3812, %v2294_v43   ;;  %p3889_p12 = pnand %p3888_p11, %p4150_p5 }
 0x5d9   : > { %2364 = vperm.xlu1 %3811, %v2293_v47  }
 0x5da   : > { %3595 = vmatmul.mubr.msk.f32.gmra.mrb[38].mxu0 %vm1683_vm5, %v1855_v60  ;;  %p3890_p13 = pneg %p3889_p12 }
 0x5db   : > { %3597 = vmatprep.mubr.msk.f32.mxu0 %vm1683_vm5, %v1857_v62 }
 0x5dd   : > { %2374 = vperm.xlu1 %3811, %v2295_v30  }
 0x5de   : > { %3598 = vmatmul.mubr.msk.f32.gmra.mrb[40].mxu0 %vm1683_vm5, %v1859_v51 }
 0x695   : > { %v3578_v3 = vpop.f32.mrb[26].mxu0 }
 0x696   : > { %v1993_v4 = vpop.f32.mrb[27].mxu0 }
 0x697   : > { %3608 = vmatprep.mubr.msk.f32.mxu1 %vm971_vm4, %v1993_v4 }
 0x698   : > { %3609 = vmatmul.mubr.msk.f32.vlgmr.msra.gmra.mrb[28].mxu1 %vm971_vm4, %v3578_v3 }
 0x699   : > { %v3581_v5 = vpop.f32.mrb[28].mxu0  ;;  %3753 = vmatpush3.bf16.msra.mxu1 %v3750_v36 }
 0x69a   : > { %v2003_v6 = vpop.f32.mrb[29].mxu0 }
 0x69b   : > { %3611 = vmatprep.mubr.msk.f32.mxu1 %vm971_vm4, %v2003_v6 }
 0x69c   : > { %3612 = vmatmul.mubr.msk.f32.gmra.mrb[30].mxu1 %vm971_vm4, %v3581_v5 }
 0x69d   : > { %v3584_v7 = vpop.f32.mrb[30].mxu0 }
 0x69e   : > { %v2013_v8 = vpop.f32.mrb[31].mxu0 }
 0x69f   : > { %3614 = vmatprep.mubr.msk.f32.mxu1 %vm971_vm4, %v2013_v8 }
 0x6a0   : > { %3615 = vmatmul.mubr.msk.f32.gmra.mrb[32].mxu1 %vm971_vm4, %v3584_v7 }
 0x6a1   : > { %v3587_v9 = vpop.f32.mrb[32].mxu0 }
 0x6a2   : > { %v2023_v10 = vpop.f32.mrb[33].mxu0 }
 0x6a3   : > { %3617 = vmatprep.mubr.msk.f32.mxu1 %vm971_vm4, %v2023_v10 }
 0x6a4   : > { %3618 = vmatmul.mubr.msk.f32.gmra.mrb[34].mxu1 %vm971_vm4, %v3587_v9 }
 0x6a5   : > { %v3590_v12 = vpop.f32.mrb[34].mxu0 }
 0x6a6   : > { %v2033_v14 = vpop.f32.mrb[35].mxu0 }
 0x6a7   : > { %3620 = vmatprep.mubr.msk.f32.mxu1 %vm971_vm4, %v2033_v14  ;;  %v2618_v14 = vld [vmem:[%s4895_s18 + $0x18] sm:$0xff] }
 0x6a8   : > { %3621 = vmatmul.mubr.msk.f32.gmra.mrb[36].mxu1 %vm971_vm4, %v3590_v12  ;;  %v2617_v12 = vld [vmem:[%s4895_s18 + $0x10] sm:$0xff] }
 0x6a9   : > { %v3593_v15 = vpop.f32.mrb[36].mxu0 }
 0x6aa   : > { %v2043_v17 = vpop.f32.mrb[37].mxu0 }
 0x6ab   : > { %3623 = vmatprep.mubr.msk.f32.mxu1 %vm971_vm4, %v2043_v17  ;;  %v2300_v17 = vpop.permute.xlu1 %2299 }
 0x6ac   : > { %3624 = vmatmul.mubr.msk.f32.gmra.mrb[38].mxu1 %vm971_vm4, %v3593_v15  ;;  %v3754_v15 = vpack.c.bf16 %v2618_v14, %v2617_v12  ;;  %v2383_v25 = vmul.f32 %v4658_v22, %v2300_v17 }
 0x6ad   : > { %v3596_v13 = vpop.f32.mrb[38].mxu0 }
 0x6ae   : > { %v2053_v16 = vpop.f32.mrb[39].mxu0  ;;  %3755 = vmatprep.subr.bf16.mxu1 %v3754_v15 }
 0x6af   : > { %3626 = vmatprep.mubr.msk.f32.mxu1 %vm971_vm4, %v2053_v16  ;;  %3757 = vmatpush3.bf16.msra.mxu1 %v3754_v15 }
 0x6b0   : > { %3627 = vmatmul.mubr.msk.f32.gmra.mrb[40].mxu1 %vm971_vm4, %v3596_v13  ;;  %v2310_v13 = vpop.permute.xlu1 %2309 }
 0x6b1   : > { %v3599_v18 = vpop.f32.mrb[40].mxu0  ;;  %v2385_v36 = vmul.f32 %v4658_v22, %v2310_v13 }
 0x6b2   : > { %v2063_v19 = vpop.f32.mrb[41].mxu0 }
 0x6b3   : > { %3629 = vmatprep.mubr.msk.f32.mxu1 %vm971_vm4, %v2063_v19 }
 0x6b4   : > { %3630 = vmatmul.mubr.msk.f32.gmra.mrb[42].mxu1 %vm971_vm4, %v3599_v18  ;;  %v2315_v16 = vpop.permute.xlu1 %2314  ;;  %v2305_v18 = vpop.permute.xlu0 %2304 }
 0x6b5   : > { %v2384_v24 = vmul.f32 %v4658_v22, %v2305_v18  ;;  %v2386_v11 = vmul.f32 %v4658_v22, %v2315_v16 }
 0x6b8   : > { %v2325_v19 = vpop.permute.xlu1 %2324  ;;  %v2320_v21 = vpop.permute.xlu0 %2319 }
 0x6b9   : > { %v2388_v43 = vmul.f32 %v4658_v22, %v2325_v19 }
 0x6bc   : > { %v2335_v27 = vpop.permute.xlu1 %2334  ;;  %v2330_v32 = vpop.permute.xlu0 %2329 }
 0x6c0   : > { %v2345_v42 = vpop.permute.xlu1 %2344  ;;  %v2340_v47 = vpop.permute.xlu0 %2339 }
 0x76b   : > { %v3610_v48 = vpop.f32.mrb[28].mxu1 }
 0x76c   : > { %v2197_v49 = vpop.f32.mrb[29].mxu1  ;;  %v2203_v45 = vadd.f32 %v3610_v48, %v3225_v33 }
 0x76d   : > { %v2198_v40 = vadd.f32 %v3225_v33, %v2197_v49 }
 0x76f   : > { %v3613_v41 = vpop.f32.mrb[30].mxu1  ;;  %3640 = vmatprep.mubr.msk.f32.mxu0 %vm971_vm4, %v2198_v40 }
 0x770   : > { %v2207_v44 = vpop.f32.mrb[31].mxu1  ;;  %3641 = vmatmul.mubr.msk.f32.vlgmr.msra.gmra.mrb[42].mxu0 %vm971_vm4, %v2203_v45  ;;  %v2213_v54 = vadd.f32 %v3613_v41, %v3225_v33 }
 0x771   : > { %v2208_v50 = vadd.f32 %v3225_v33, %v2207_v44  ;;  %v2390_v44 = vmul.f32 %v4658_v22, %v2335_v27 }
 0x773   : > { %v3616_v53 = vpop.f32.mrb[32].mxu1  ;;  %3643 = vmatprep.mubr.msk.f32.mxu0 %vm971_vm4, %v2208_v50 }
 0x774   : > { %v2217_v55 = vpop.f32.mrb[33].mxu1  ;;  %3644 = vmatmul.mubr.msk.f32.gmra.mrb[44].mxu0 %vm971_vm4, %v2213_v54  ;;  %v2223_v57 = vadd.f32 %v3616_v53, %v3225_v33  ;;  %v2389_v54 = vmul.f32 %v4658_v22, %v2330_v32 }
 0x775   : > { %v2218_v56 = vadd.f32 %v3225_v33, %v2217_v55  ;;  %v2355_v55 = vpop.permute.xlu1 %2354 }
 0x777   : > { %v3619_v58 = vpop.f32.mrb[34].mxu1  ;;  %3646 = vmatprep.mubr.msk.f32.mxu0 %vm971_vm4, %v2218_v56 }
 0x778   : > { %v2227_v46 = vpop.f32.mrb[35].mxu1  ;;  %3647 = vmatmul.mubr.msk.f32.gmra.mrb[46].mxu0 %vm971_vm4, %v2223_v57  ;;  %v2233_v59 = vadd.f32 %v3619_v58, %v3225_v33 }
 0x779   : > { %v2228_v52 = vadd.f32 %v3225_v33, %v2227_v46  ;;  %v2350_v46 = vpop.permute.xlu0 %2349 }
 0x77b   : > { %v3622_v60 = vpop.f32.mrb[36].mxu1  ;;  %3649 = vmatprep.mubr.msk.f32.mxu0 %vm971_vm4, %v2228_v52 }
 0x77c   : > { %v2237_v61 = vpop.f32.mrb[37].mxu1  ;;  %3650 = vmatmul.mubr.msk.f32.gmra.mrb[48].mxu0 %vm971_vm4, %v2233_v59  ;;  %v2243_v63 = vadd.f32 %v3622_v60, %v3225_v33  ;;  %v2392_v59 = vmul.f32 %v4658_v22, %v2345_v42 }
 0x77d   : > { %v2238_v62 = vadd.f32 %v3225_v33, %v2237_v61  ;;  %v2391_v61 = vmul.f32 %v4658_v22, %v2340_v47 }
 0x77f   : > { %v3625_v51 = vpop.f32.mrb[38].mxu1  ;;  %3652 = vmatprep.mubr.msk.f32.mxu0 %vm971_vm4, %v2238_v62 }
 0x780   : > { %v2247_v0 = vpop.f32.mrb[39].mxu1  ;;  %3653 = vmatmul.mubr.msk.f32.gmra.mrb[50].mxu0 %vm971_vm4, %v2243_v63  ;;  %v2253_v2 = vadd.f32 %v3625_v51, %v3225_v33 }
 0x781   : > { %v2248_v1 = vadd.f32 %v3225_v33, %v2247_v0 }
 0x783   : > { %v3628_v3 = vpop.f32.mrb[40].mxu1  ;;  %3655 = vmatprep.mubr.msk.f32.mxu0 %vm971_vm4, %v2248_v1 }
 0x784   : > { %v2257_v4 = vpop.f32.mrb[41].mxu1  ;;  %3656 = vmatmul.mubr.msk.f32.gmra.mrb[52].mxu0 %vm971_vm4, %v2253_v2  ;;  %v2263_v6 = vadd.f32 %v3628_v3, %v3225_v33  ;;  %v2365_v2 = vpop.permute.xlu1 %2364  ;;  %v2394_v3 = vmul.f32 %v4658_v22, %v2355_v55 }
 0x785   : > { %v2258_v5 = vadd.f32 %v3225_v33, %v2257_v4  ;;  %v2360_v4 = vpop.permute.xlu0 %2359  ;;  %v2396_v14 = vmul.f32 %v4658_v22, %v2365_v2 }
 0x786   : > { %v2395_v17 = vmul.f32 %v4658_v22, %v2360_v4 }
 0x787   : > { %v3631_v7 = vpop.f32.mrb[42].mxu1  ;;  %3658 = vmatprep.mubr.msk.f32.mxu0 %vm971_vm4, %v2258_v5 }
 0x788   : > { %v2267_v8 = vpop.f32.mrb[43].mxu1  ;;  %3659 = vmatmul.mubr.msk.f32.gmra.mrb[54].mxu0 %vm971_vm4, %v2263_v6  ;;  %v2273_v10 = vadd.f32 %v3631_v7, %v3225_v33  ;;  %v2393_v6 = vmul.f32 %v4658_v22, %v2350_v46  ;;  %v2375_v16 = vpop.permute.xlu1 %2374 }
 0x789   : > { %v2268_v9 = vadd.f32 %v3225_v33, %v2267_v8  ;;  %v2387_v33 = vmul.f32 %v4658_v22, %v2320_v21 }
 0x78b   : > { %3661 = vmatprep.mubr.msk.f32.mxu0 %vm971_vm4, %v2268_v9 }
 0x78c   : > { %3662 = vmatmul.mubr.msk.f32.gmra.mrb[56].mxu0 %vm971_vm4, %v2273_v10 }
 0x843   : > { %v3642_v26 = vpop.f32.mrb[42].mxu0 }
 0x844   : > { %v2519_v28 = vadd.f32 %v3642_v26, %v2384_v24  ;;  %v2513_v31 = vpop.f32.mrb[43].mxu0  ;;  %v2370_v24 = vpop.permute.xlu0 %2369  ;;  %v2398_v26 = vmul.f32 %v4658_v22, %v2375_v16 }
 0x845   : > { %v2514_v35 = vadd.f32 %v2513_v31, %v2383_v25 }
 0x846   : > { %v2600_v20 = vadd.f32 %v4665_v29, %v2519_v28  ;;  %v2397_v28 = vmul.f32 %v4658_v22, %v2370_v24  ;;  %v4716_v22 = vld [vmem:[%s4896_s19] ss:$0 sm:$0xff] }
 0x847   : > { %v2599_v37 = vadd.f32 %v4665_v29, %v2514_v35  ;;  %v3645_v34 = vpop.f32.mrb[44].mxu0 }
 0x848   : > { %v2529_v38 = vadd.f32 %v3645_v34, %v2386_v11  ;;  %v2523_v23 = vpop.f32.mrb[45].mxu0 }
 0x849   : > { %v2524_v39 = vadd.f32 %v2523_v23, %v2385_v36  ;;  %3672 = vmatprep.mubr.msk.f32.mxu1 %vm971_vm4, %v2599_v37 }
 0x84a   : > { %3673 = vmatmul.mubr.msk.f32.vlgmr.msra.gmra.mrb[44].mxu1 %vm971_vm4, %v2600_v20  ;;  %v2602_v49 = vadd.f32 %v4665_v29, %v2529_v38 }
 0x84b   : > { %v2601_v30 = vadd.f32 %v4665_v29, %v2524_v39  ;;  %v3648_v48 = vpop.f32.mrb[46].mxu0 }
 0x84c   : > { %v2539_v40 = vadd.f32 %v3648_v48, %v2388_v43  ;;  %v2533_v45 = vpop.f32.mrb[47].mxu0 }
 0x84d   : > { %v2534_v41 = vadd.f32 %v2533_v45, %v2387_v33  ;;  %3675 = vmatprep.mubr.msk.f32.mxu1 %vm971_vm4, %v2601_v30 }
 0x84e   : > { %3676 = vmatmul.mubr.msk.f32.gmra.mrb[46].mxu1 %vm971_vm4, %v2602_v49  ;;  %v2604_v56 = vadd.f32 %v4665_v29, %v2539_v40 }
 0x84f   : > { %v2603_v50 = vadd.f32 %v4665_v29, %v2534_v41  ;;  %v3651_v53 = vpop.f32.mrb[48].mxu0 }
 0x850   : > { %v2549_v57 = vadd.f32 %v3651_v53, %v2390_v44  ;;  %v2543_v58 = vpop.f32.mrb[49].mxu0 }
 0x851   : > { %v2544_v52 = vadd.f32 %v2543_v58, %v2389_v54  ;;  %3678 = vmatprep.mubr.msk.f32.mxu1 %vm971_vm4, %v2603_v50 }
 0x852   : > { %3679 = vmatmul.mubr.msk.f32.gmra.mrb[48].mxu1 %vm971_vm4, %v2604_v56  ;;  %v2606_v63 = vadd.f32 %v4665_v29, %v2549_v57 }
 0x853   : > { %v2605_v60 = vadd.f32 %v4665_v29, %v2544_v52  ;;  %v3654_v62 = vpop.f32.mrb[50].mxu0 }
 0x854   : > { %v2559_v51 = vadd.f32 %v3654_v62, %v2392_v59  ;;  %v2553_v0 = vpop.f32.mrb[51].mxu0 }
 0x855   : > { %v2554_v1 = vadd.f32 %v2553_v0, %v2391_v61  ;;  %3681 = vmatprep.mubr.msk.f32.mxu1 %vm971_vm4, %v2605_v60 }
 0x856   : > { %3682 = vmatmul.mubr.msk.f32.gmra.mrb[50].mxu1 %vm971_vm4, %v2606_v63  ;;  %v2608_v8 = vadd.f32 %v4665_v29, %v2559_v51 }
 0x857   : > { %v2607_v5 = vadd.f32 %v4665_v29, %v2554_v1  ;;  %v3657_v7 = vpop.f32.mrb[52].mxu0 }
 0x858   : > { %v2569_v9 = vadd.f32 %v3657_v7, %v2394_v3  ;;  %v2563_v10 = vpop.f32.mrb[53].mxu0 }
 0x859   : > { %v2564_v12 = vadd.f32 %v2563_v10, %v2393_v6  ;;  %3684 = vmatprep.mubr.msk.f32.mxu1 %vm971_vm4, %v2607_v5 }
 0x85a   : > { %3685 = vmatmul.mubr.msk.f32.gmra.mrb[52].mxu1 %vm971_vm4, %v2608_v8  ;;  %v2610_v18 = vadd.f32 %v4665_v29, %v2569_v9 }
 0x85b   : > { %v2609_v15 = vadd.f32 %v4665_v29, %v2564_v12  ;;  %v3660_v13 = vpop.f32.mrb[54].mxu0 }
 0x85c   : > { %v2579_v19 = vadd.f32 %v3660_v13, %v2396_v14  ;;  %v2573_v21 = vpop.f32.mrb[55].mxu0 }
 0x85d   : > { %v2574_v25 = vadd.f32 %v2573_v21, %v2395_v17  ;;  %3687 = vmatprep.mubr.msk.f32.mxu1 %vm971_vm4, %v2609_v15 }
 0x85e   : > { %3688 = vmatmul.mubr.msk.f32.gmra.mrb[54].mxu1 %vm971_vm4, %v2610_v18  ;;  %v2612_v32 = vadd.f32 %v4665_v29, %v2579_v19 }
 0x85f   : > { %v2611_v27 = vadd.f32 %v4665_v29, %v2574_v25  ;;  %v3663_v31 = vpop.f32.mrb[56].mxu0 }
 0x860   : > { %v2589_v35 = vadd.f32 %v3663_v31, %v2398_v26  ;;  %v2583_v11 = vpop.f32.mrb[57].mxu0 }
 0x861   : > { %v2584_v36 = vadd.f32 %v2583_v11, %v2397_v28  ;;  %3690 = vmatprep.mubr.msk.f32.mxu1 %vm971_vm4, %v2611_v27 }
 0x862   : > { %3691 = vmatmul.mubr.msk.f32.gmra.mrb[56].mxu1 %vm971_vm4, %v2612_v32  ;;  %v2614_v34 = vadd.f32 %v4665_v29, %v2589_v35 }
 0x863   : > { %v2613_v37 = vadd.f32 %v4665_v29, %v2584_v36 }
 0x865   : > { %3693 = vmatprep.mubr.msk.f32.mxu1 %vm971_vm4, %v2613_v37 }
 0x866   : > { %3694 = vmatmul.mubr.msk.f32.gmra.mrb[58].mxu1 %vm971_vm4, %v2614_v34 }
 0x91d   : > { %v3674_v20 = vpop.f32.mrb[44].mxu1 }
 0x91e   : > { %v2746_v29 = vadd.f32 %v3674_v20, %v4716_v22  ;;  %v2740_v38 = vpop.f32.mrb[45].mxu1 }
 0x91f   : > { %v2741_v23 = vadd.f32 %v4716_v22, %v2740_v38 }
 0x920   : > { %2820 = vst.msk [vmem:[%s4722_s29 + $0x8] sm:$0xff] %vm1069_vm3, %v2746_v29  ;;  %v2837_v39 = vsel %vm2835_vm6, %v2746_v29, 0.0 }
 0x921   : > { %2819 = vst.msk [vmem:[%s4722_s29] sm:$0xff] %vm1069_vm3, %v2741_v23  ;;  %v2836_v42 = vsel %vm2835_vm6, %v2741_v23, 0.0  ;;  %v3677_v43 = vpop.f32.mrb[46].mxu1 }
 0x922   : > { %v2838_v47 = vadd.f32 %v2837_v39, %v2836_v42  ;;  %v2756_v30 = vadd.f32 %v3677_v43, %v4716_v22  ;;  %v2750_v33 = vpop.f32.mrb[47].mxu1 }
 0x923   : > { %v2751_v48 = vadd.f32 %v4716_v22, %v2750_v33 }
 0x924   : > { %2822 = vst.msk [vmem:[%s4722_s29 + $0x18] sm:$0xff] %vm1069_vm3, %v2756_v30  ;;  %v2841_v50 = vsel %vm2835_vm6, %v2756_v30, 0.0 }
 0x925   : > { %2821 = vst.msk [vmem:[%s4722_s29 + $0x10] sm:$0xff] %vm1069_vm3, %v2751_v48  ;;  %v2839_v49 = vsel %vm2835_vm6, %v2751_v48, 0.0  ;;  %v3680_v40 = vpop.f32.mrb[48].mxu1 }
 0x926   : > { %v2840_v45 = vadd.f32 %v2839_v49, %v2838_v47  ;;  %v2766_v41 = vadd.f32 %v3680_v40, %v4716_v22  ;;  %v2760_v44 = vpop.f32.mrb[49].mxu1 }
 0x927   : > { %v2761_v54 = vadd.f32 %v4716_v22, %v2760_v44 }
 0x928   : > { %2824 = vst.msk [vmem:[%s4722_s29 + $0x28] sm:$0xff] %vm1069_vm3, %v2766_v41  ;;  %v2842_v53 = vadd.f32 %v2841_v50, %v2840_v45  ;;  %v2845_v52 = vsel %vm2835_vm6, %v2766_v41, 0.0 }
 0x929   : > { %2823 = vst.msk [vmem:[%s4722_s29 + $0x20] sm:$0xff] %vm1069_vm3, %v2761_v54  ;;  %v2843_v55 = vsel %vm2835_vm6, %v2761_v54, 0.0  ;;  %v3683_v56 = vpop.f32.mrb[50].mxu1 }
 0x92a   : > { %v2844_v57 = vadd.f32 %v2843_v55, %v2842_v53  ;;  %v2776_v58 = vadd.f32 %v3683_v56, %v4716_v22  ;;  %v2770_v46 = vpop.f32.mrb[51].mxu1 }
 0x92b   : > { %v2771_v59 = vadd.f32 %v4716_v22, %v2770_v46 }
 0x92c   : > { %2826 = vst.msk [vmem:[%s4722_s29 + $0x38] sm:$0xff] %vm1069_vm3, %v2776_v58  ;;  %v2846_v60 = vadd.f32 %v2845_v52, %v2844_v57  ;;  %v2849_v1 = vsel %vm2835_vm6, %v2776_v58, 0.0 }
 0x92d   : > { %2825 = vst.msk [vmem:[%s4722_s29 + $0x30] sm:$0xff] %vm1069_vm3, %v2771_v59  ;;  %v2847_v61 = vsel %vm2835_vm6, %v2771_v59, 0.0  ;;  %v3686_v62 = vpop.f32.mrb[52].mxu1 }
 0x92e   : > { %v2848_v63 = vadd.f32 %v2847_v61, %v2846_v60  ;;  %v2786_v51 = vadd.f32 %v3686_v62, %v4716_v22  ;;  %v2780_v0 = vpop.f32.mrb[53].mxu1 }
 0x92f   : > { %v2781_v2 = vadd.f32 %v4716_v22, %v2780_v0 }
 0x930   : > { %v2850_v3 = vadd.f32 %v2849_v1, %v2848_v63  ;;  %2828 = vst.msk [vmem:[%s4722_s29 + $0x48] sm:$0xff] %vm1069_vm3, %v2786_v51  ;;  %v2860_v4 = vsel %vm2835_vm6, %v2786_v51, 0.0 }
 0x931   : > { %2827 = vst.msk [vmem:[%s4722_s29 + $0x40] sm:$0xff] %vm1069_vm3, %v2781_v2  ;;  %v2859_v5 = vsel %vm2835_vm6, %v2781_v2, 0.0  ;;  %v3689_v6 = vpop.f32.mrb[54].mxu1 }
 0x932   : > { %v2861_v7 = vadd.f32 %v2860_v4, %v2859_v5  ;;  %v2796_v8 = vadd.f32 %v3689_v6, %v4716_v22  ;;  %v2790_v9 = vpop.f32.mrb[55].mxu1  ;;  %v2851_v15 = vrot.slane %v2850_v3, 4 }
 0x933   : > { %v2791_v10 = vadd.f32 %v4716_v22, %v2790_v9 }
 0x934   : > { %2830 = vst.msk [vmem:[%s4722_s29 + $0x58] sm:$0xff] %vm1069_vm3, %v2796_v8  ;;  %v2864_v18 = vsel %vm2835_vm6, %v2796_v8, 0.0  ;;  %v2852_v26 = vadd.f32 %v2851_v15, %v2850_v3 }
 0x935   : > { %2829 = vst.msk [vmem:[%s4722_s29 + $0x50] sm:$0xff] %vm1069_vm3, %v2791_v10  ;;  %v2862_v12 = vsel %vm2835_vm6, %v2791_v10, 0.0  ;;  %v3692_v14 = vpop.f32.mrb[56].mxu1 }
 0x936   : > { %v2863_v17 = vadd.f32 %v2862_v12, %v2861_v7  ;;  %v2806_v13 = vadd.f32 %v3692_v14, %v4716_v22  ;;  %v2800_v16 = vpop.f32.mrb[57].mxu1  ;;  %v2853_v37 = vrot.slane %v2852_v26, 2 }
 0x937   : > { %v2801_v19 = vadd.f32 %v4716_v22, %v2800_v16 }
 0x938   : > { %2832 = vst.msk [vmem:[%s4722_s29 + $0x68] sm:$0xff] %vm1069_vm3, %v2806_v13  ;;  %v2865_v21 = vadd.f32 %v2864_v18, %v2863_v17  ;;  %v2868_v32 = vsel %vm2835_vm6, %v2806_v13, 0.0  ;;  %v2854_v38 = vadd.f32 %v2853_v37, %v2852_v26 }
 0x939   : > { %2831 = vst.msk [vmem:[%s4722_s29 + $0x60] sm:$0xff] %vm1069_vm3, %v2801_v19  ;;  %v2866_v24 = vsel %vm2835_vm6, %v2801_v19, 0.0  ;;  %v3695_v25 = vpop.f32.mrb[58].mxu1 }
 0x93a   : > { %v2867_v27 = vadd.f32 %v2866_v24, %v2865_v21  ;;  %v2816_v28 = vadd.f32 %v3695_v25, %v4716_v22  ;;  %v2810_v31 = vpop.f32.mrb[59].mxu1  ;;  %v2855_v43 = vrot.slane %v2854_v38, 1 }
 0x93b   : > { %v2811_v35 = vadd.f32 %v4716_v22, %v2810_v31 }
 0x93c   : > { %2834 = vst.msk [vmem:[%s4722_s29 + $0x78] sm:$0xff] %vm1069_vm3, %v2816_v28  ;;  %v2869_v11 = vadd.f32 %v2868_v32, %v2867_v27  ;;  %v2872_v20 = vsel %vm2835_vm6, %v2816_v28, 0.0  ;;  %v2856_v22 = vadd.f32 %v2855_v43, %v2854_v38 }
 0x93d   : > { %2833 = vst.msk [vmem:[%s4722_s29 + $0x70] sm:$0xff] %vm1069_vm3, %v2811_v35  ;;  %v2870_v36 = vsel %vm2835_vm6, %v2811_v35, 0.0  ;;  %s2934_s29 = scalar_lea.sflag [#allocation3], %s4790_s27 }
 0x93e   : > { %v2871_v34 = vadd.f32 %v2870_v36, %v2869_v11  ;;  %v2858_v48 = vmul.f32 0.015625, %v2856_v22 }
 0x940   : > { %v2873_v29 = vadd.f32 %v2872_v20, %v2871_v34 }
 0x942   : > { %v2874_v23 = vrot.slane %v2873_v29, 4 }
 0x944   : > { %v2875_v39 = vadd.f32 %v2874_v23, %v2873_v29 }
 0x946   : > { %v2876_v42 = vrot.slane %v2875_v39, 2 }
 0x948   : > { %v2877_v47 = vadd.f32 %v2876_v42, %v2875_v39 }
 0x94a   : > { %v2878_v30 = vrot.slane %v2877_v47, 1 }
 0x94c   : > { %v2879_v33 = vadd.f32 %v2878_v30, %v2877_v47 }
 0x94e   : > { %v2880_v49 = vmul.f32 0.015625, %v2879_v33 }
 0x950   : > { %v2882_v40 = vsel %vm2881_vm7, %v2858_v48, %v2880_v49 }
 0x951   : > { %2884 = vrot.lane.b32.xlu0 %v2882_v40, %s4912_s0 }
 0x9c3   : > { %v2885_v45 = vpop.permute.xlu0 %2884 }
 0x9c4   : > { %2888 = vst.msk [vmem:[%s749_s2] sm:$0x3] %vm2887_vm8, %v2885_v45  ;;  %v2889_v41 = vmax.f32 %v2882_v40, %v2885_v45 }
 0x9c6   : > { %2894 = vrot.lane.b32.xlu1 %v2889_v41, %s3989_s24  ;;  %v2890_v55 = vsub.f32 %v2882_v40, %v2889_v41 }
 0x9c8   : > { %v2891_v56 = vmul.f32 1.442695, %v2890_v55 }
 0xa38   : > { %v2895_v44 = vpop.permute.xlu1 %2894 }
 0xa39   : > { %v2897_v50 = vsub.f32 %v2882_v40, %v2895_v44 }
 0xa3b   : > { %v2898_v54 = vmul.f32 1.442695, %v2897_v50 }
 0xa3d   : > { %3879 = vpow2.f32 %v2898_v54 }
 0xa3e   : > { %3881 = vpow2.f32 %v2891_v56 }
 0xa47   : > { %v3880_v53 = vpop.eup %3879 }
 0xa48   : > { %2901 = vrot.lane.b32.xlu0 %v3880_v53, %s4912_s0  ;;  %v3882_v57 = vpop.eup %3881 }
 0xaba   : > { %v2902_v58 = vpop.permute.xlu0 %2901 }
 0xabb   : > { %v2904_v46 = vadd.f32 %v3882_v57, %v2902_v58 }
 0xabd   : > { %3883 = vrcp.f32 %v2904_v46  ;;  %2908 = vrot.lane.b32.xlu1 %v2904_v46, %s3989_s24  ;;  %s3990_s24 = smov [#allocation2]  }
 0xabe   : > { %s3891_s1 = sshll.u32 %s3990_s24, 4  ;;  %s3892_s1 = int_to_ptr.vmem [resolvable:$false] %s3891_s1 }
 0xabf   : > { %p3894_p0 = scmp.lt.s32.totalorder %s2959_s6, %s3892_s1 }
 0xac7   : > { %v3884_v52 = vpop.eup %3883 }
 0xac8   : > { %v2906_v59 = vmul.f32 %v3884_v52, %v3882_v57 }
 0xaca   : > { %2914 = vrot.lane.b32.xlu0 %v2906_v59, %s4912_s0  ;;  %s3893_s0 = scalar_lea.vmem %s3892_s1, 64 }
 0xacb   : > { %p3895_p1 = scmp.lt.s32.totalorder %s3893_s0, %s3887_s3 }
 0xacd   : > { %p3896_p2 = por %p3895_p1, %p3894_p0 }
 0xacf   : > { %p3897_p3 = pnand %p3896_p2, %p3890_p13 }
 0xb2f   : > { %v2909_v60 = vpop.permute.xlu1 %2908 }
 0xb30   : > { %3885 = vrcp.f32 %v2909_v60 }
 0xb31   : > { %3900 = shalt.err (!%p3897_p3)
}
 0xb32   : > { %s3901_s2 = scalar_lea.hbm %s4804_s26, 32  ;;  %s3905_s24 = scalar_lea.hbm %s4899_s22, 64 }
 0xb33   : > { %p3902_p4 = scmp.ne.s32.totalorder %s4804_s26, %s3901_s2  ;;  %p3906_p9 = scmp.lt.u32.totalorder %s4804_s26, %s4899_s22 }
 0xb34   : > { %p3907_p10 = scmp.lt.u32.totalorder %s3905_s24, %s3901_s2  ;;  %p3909_p12 = scmp.lt.u32.totalorder %s3901_s2, %s4804_s26 }
 0xb35   : > { %p3903_p7 = pnand %p3902_p4, %p4150_p5 }
 0xb36   : > { %p3908_p11 = por %p3907_p10, %p3906_p9 }
 0xb37   : > { %p3904_p8 = pneg %p3903_p7 }
 0xb38   : > { %p3910_p13 = por %p3909_p12, %p3908_p11 }
 0xb3a   : > { %p3911_p0 = pnand %p3910_p13, %p3904_p8 }
 0xb3c   : > { %3914 = shalt.err (!%p3911_p0)
}
 0xb3d   : > { %3760 = dma.vmem_to_hbm [thread:$0]  (%p4150_p5), %s2959_s6, 32, %s4804_s26, %s2934_s29   ;;  %v3886_v61 = vpop.eup %3885  ;;  %v2915_v63 = vpop.permute.xlu0 %2914 }
 0xb3e   : > { %v2912_v62 = vmul.f32 %v3886_v61, %v3880_v53  ;;  %s4938_s0 = smov 124   ;;  %s4939_s3 = sshll.u32 %s4790_s27, 1 }
 0xb3f   : > { %s756_s28 = scalar_lea.vmem [#allocation4], %s4939_s3  ;;  %s4940_s2 = sshll.u32 %s4133_s5, 5 }
 0xb40   : > { %2918 = vrot.lane.b32.xlu1 %v2912_v62, %s4938_s0  ;;  %s2971_s4 = sshll.u32 %s756_s28, 4  ;;  %s4832_s1 = scalar_lea.hbm %s4900_s23, %s4940_s2  ;;  %s4834_s4 = int_to_ptr.vmem [resolvable:$true] %s2971_s4 }
 0xb41   : > { %s2939_s26 = scalar_lea.sflag [#allocation5], %s4790_s27  ;;  %s3915_s6 = scalar_lea.vmem %s4834_s4, 32 }
 0xb42   : > { %p3916_p1 = scmp.ne.s32.totalorder %s4834_s4, %s3915_s6  ;;  %s3991_s5 = smov [#allocation4]  }
 0xb43   : > { %s3919_s29 = sshll.u32 %s3991_s5, 4  ;;  %s3920_s29 = int_to_ptr.vmem [resolvable:$false] %s3919_s29 }
 0xb44   : > { %p3917_p2 = pnand %p3916_p1, %p4150_p5  ;;  %s3921_s0 = scalar_lea.vmem %s3920_s29, 64 }
 0xb45   : > { %p3922_p4 = scmp.lt.s32.totalorder %s4834_s4, %s3920_s29  ;;  %p3923_p7 = scmp.lt.s32.totalorder %s3921_s0, %s3915_s6 }
 0xb46   : > { %p3918_p3 = pneg %p3917_p2 }
 0xb47   : > { %p3924_p8 = por %p3923_p7, %p3922_p4 }
 0xb49   : > { %p3925_p9 = pnand %p3924_p8, %p3918_p3 }
 0xbb2   : > { %v2919_v51 = vpop.permute.xlu1 %2918 }
 0xbb3   : > { %v2921_v0 = vsel %vm1069_vm3, %v2915_v63, %v2919_v51 }
 0xbb4   : > { %2922 = vst.msk [vmem:[%s756_s28] sm:$0x3] %vm2887_vm8, %v2921_v0 }
 0xbb5   : > { %3928 = shalt.err (!%p3925_p9)
}
 0xbb6   : > { %s3929_s27 = scalar_lea.hbm %s4832_s1, 32  ;;  %s3933_s2 = scalar_lea.hbm %s4900_s23, 64 }
 0xbb7   : > { %p3930_p10 = scmp.ne.s32.totalorder %s4832_s1, %s3929_s27  ;;  %p3934_p13 = scmp.lt.u32.totalorder %s4832_s1, %s4900_s23 }
 0xbb8   : > { %p3935_p0 = scmp.lt.u32.totalorder %s3933_s2, %s3929_s27  ;;  %p3937_p2 = scmp.lt.u32.totalorder %s3929_s27, %s4832_s1 }
 0xbb9   : > { %p3931_p11 = pnand %p3930_p10, %p4150_p5 }
 0xbba   : > { %p3936_p1 = por %p3935_p0, %p3934_p13 }
 0xbbb   : > { %p3932_p12 = pneg %p3931_p11 }
 0xbbc   : > { %p3938_p3 = por %p3937_p2, %p3936_p1 }
 0xbbe   : > { %p3939_p4 = pnand %p3938_p3, %p3932_p12 }
 0xbc0   : > { %3942 = shalt.err (!%p3939_p4)
}
 0xbc1   : > { %3761 = dma.vmem_to_hbm [thread:$0]  (%p4150_p5), %s4834_s4, 32, %s4832_s1, %s2939_s26  }
 0xbc2 PF: > { %s4941_s6 = sld [smem:[#allocation10_spill]]  ;;  %s4942_s5 = sld [smem:[#allocation8_spill]] }
 0xbc8   : > { %p3771_p7 = scmp.ge.s32.totalorder %s4941_s6, 2  ;;  %s2999_s0 = sand.u32 1, %s4942_s5  }
 0xbc9   : > { %s3000_s3 = scalar_lea.sflag [#allocation3], %s2999_s0 }
 0xbca   : > { %p3765_p8 = pnand %p3771_p7, %p4154_p6 }
 0xbcc   : > { %3960 = dma.done.wait (!%p3765_p8), %s3000_s3, 32  }
 0xbcd   : > { %3962 = vsyncadd (!%p3765_p8), %s3000_s3, 4294967264  ;;  %s3009_s27 = scalar_lea.sflag [#allocation5], %s2999_s0 }
 0xbce   : > { %3964 = dma.done.wait (!%p3765_p8), %s3009_s27, 32  }
 0xbcf   : > { %3966 = vsyncadd (!%p3765_p8), %s3009_s27, 4294967264  ;;  %s4944_s25 = sld [smem:[#allocation11_spill]]  ;;  %s4945_s7 = sld [smem:[#allocation9_spill]] }
 0xbd0   : > { %s4946_s24 = sld [smem:[#allocation12_spill]]  ;;  %s4947_s4 = smov %s3973_s30 }
 0xbd5   : > { %p37_p5 = scmp.ge.s32.totalorder %s4944_s25, 4   ;;  %s4948_s30 = smov %s4945_s7 }
 0xbd7   :  { %39 = sbr.rel (!%p37_p5) target bundleno = 14 (0xe), region = 182 }
 0xbde   :  { %3014 = vsyncpa [#allocation3], 1 }
 0xbdf   :  { %3016 = vsyncpa [#allocation3 + $0x1], 1 }
 0xbe0   :  { %3017 = vsyncpa [#allocation5], 1 }
 0xbe1   :  { %3019 = vsyncpa [#allocation5 + $0x1], 1 }

</bundles_post_ra>
